<compile_context>
chip_gen: v5e
topology: v5e:2x2
jax: 0.10.0
libtpu: 0.0.40
codegen_flags: <defaults>
</compile_context>

<pallas_src>
import functools

import jax
import jax.numpy as jnp
from jax.experimental import pallas as pl
from jax.experimental.pallas import tpu as pltpu


# ----------------------------- Pallas kernel -----------------------------
def _filter_classifier_kernel(feat_ref, filt_ref, mask_ref, o_ref, *, shifts):
    """One block of Nb images per grid step.

    feat_ref: (Nb, S, C, HW)  flat (lane-dense) features, input dtype (f32/bf16)
    filt_ref: (T, S, C)       projected filter, tap-major, f32
    mask_ref: (T, HW)         per-tap validity mask (0/1 f32)
    o_ref:    (Nb, S, HW)     scores (f32), written once as a full block
    """
    Nb, S, C, HW = feat_ref.shape
    T = mask_ref.shape[0]

    # Load once; upcast in-register (HBM/VMEM traffic stays in feat's dtype).
    feat = feat_ref[...].reshape(Nb * S, C, HW).astype(jnp.float32)
    filt = filt_ref[...].astype(jnp.float32)                     # (T, S, C)

    acc = jnp.zeros((Nb, S, HW), jnp.float32)
    for t in range(T):
        sh = shifts[t]
        # Circular lane roll == shifted tap slab.  The wrapped positions are
        # exactly the positions mask[t] zeroes, so no halo/staging is needed.
        slab = pltpu.roll(feat, shift=sh, axis=2) if sh else feat   # (Nb*S, C, HW)
        w_t = filt[t].reshape(1, S, C, 1)                           # per-(s,c) scalar
        contrib = jnp.sum(slab.reshape(Nb, S, C, HW) * w_t, axis=2)  # (Nb, S, HW)
        acc = acc + contrib * mask_ref[t].reshape(1, 1, HW)         # post-reduction mask
    o_ref[...] = acc.astype(o_ref.dtype)                            # single full store


# --------------------------- wrapper ---------------------------
def _default_feat_dtype():
    try:
        kind = jax.devices()[0].device_kind.lower()
    except Exception:
        return jnp.float32
    # bf16 feat only where the VPU is bf16-native (v6e / v7x); f32 elsewhere.
    return jnp.bfloat16 if ("v6" in kind or "v7" in kind) else jnp.float32


def linear_filter_classifier_forward(feat, filt, weight=None, bias=None,
                                     project_filter=True, feat_dtype=None,
                                     images_per_step=None):
    """LinearFilterClassifier.forward.

    feat: (N, S, C, H, W); filt: (S, C, fH, fW); weight/bias: nn.Linear(C, C).
    Returns scores (N, S, H, W), float32.
    """
    N, S, C, H, W = feat.shape
    S2, C2, fH, fW = filt.shape
    assert S2 == S and C2 == C, (filt.shape, feat.shape)
    # apply_filter uses padding=f//2 ('same' output); odd taps as in pytracking.
    assert fH % 2 == 1 and fW % 2 == 1, "odd filter sizes expected"
    ph, pw = fH // 2, fW // 2
    T = fH * fW
    HW = H * W

    f32 = jnp.float32
    if feat_dtype is None:
        feat_dtype = _default_feat_dtype()

    # ---- nn.Linear filter projection: literal PyTorch semantics, tiny XLA matmul ----
    if project_filter:
        if weight is None or bias is None:
            raise ValueError("project_filter=True requires weight and bias")
        fp = jnp.dot(filt.reshape(-1, C).astype(f32), weight.astype(f32).T,
                     precision=jax.lax.Precision.HIGHEST) + bias.astype(f32)
        fp = fp.reshape(S, C, fH, fW)
    else:
        fp = filt.astype(f32)

    # tap-major filter for the kernel: (T, S, C), tap index t = dy*fW + dx
    filt_taps = jnp.transpose(fp, (2, 3, 0, 1)).reshape(T, S, C)

    # lane-dense features: flatten spatial dims; carry in bf16 on v6e/v7x
    feat_flat = feat.reshape(N, S, C, HW).astype(feat_dtype)

    # per-tap circular-roll shifts + validity masks (grid-invariant, tiny)
    pos = jnp.arange(HW, dtype=jnp.int32)
    yy, xx = pos // W, pos % W
    shifts, mask_rows = [], []
    for dy in range(fH):
        for dx in range(fW):
            oy, ox = dy - ph, dx - pw
            shifts.append((-(oy * W + ox)) % HW)      # non-negative roll amount
            valid = ((yy + oy >= 0) & (yy + oy < H) &
                     (xx + ox >= 0) & (xx + ox < W))
            mask_rows.append(valid.astype(f32))
    masks = jnp.stack(mask_rows, axis=0)               # (T, HW)

    # images per grid step: amortize ~0.35us/step overhead for large N while
    # keeping >=2 parallel steps so v7x's two TensorCores both get work.
    if images_per_step is None:
        per_image = S * C * HW * jnp.dtype(feat_dtype).itemsize
        images_per_step = 1
        nb = 2
        while nb <= N:
            if N % nb == 0:
                if N // nb < 2 or nb * per_image > (2 << 20):
                    break
                images_per_step = nb
            nb += 1
    assert N % images_per_step == 0, (N, images_per_step)
    Nb = images_per_step

    kernel = functools.partial(_filter_classifier_kernel, shifts=tuple(shifts))

    out = pl.pallas_call(
        kernel,
        out_shape=jax.ShapeDtypeStruct((N, S, HW), f32),
        grid=(N // Nb,),
        in_specs=[
            pl.BlockSpec((Nb, S, C, HW), lambda n: (n, 0, 0, 0)),
            pl.BlockSpec((T, S, C), lambda n: (0, 0, 0)),
            pl.BlockSpec((T, HW), lambda n: (0, 0)),
        ],
        out_specs=pl.BlockSpec((Nb, S, HW), lambda n: (n, 0, 0)),
        compiler_params=pltpu.CompilerParams(
            dimension_semantics=("parallel",)),
    )(feat_flat, filt_taps, masks)

    return out.reshape(N, S, H, W)


# --------------------------- pure-JAX reference (for checking) ---------------------------
def _ref_forward(feat, filt, weight=None, bias=None, project_filter=True):
    N, S, C, H, W = feat.shape
    if project_filter:
        fp = (jnp.dot(filt.reshape(-1, C), weight.T,
                      precision=jax.lax.Precision.HIGHEST) + bias).reshape(filt.shape)
    else:
        fp = filt
    fH, fW = fp.shape[-2:]
    x = feat.reshape(N, S * C, H, W)
    out = jax.lax.conv_general_dilated(
        x, fp, window_strides=(1, 1),
        padding=((fH // 2, fH // 2), (fW // 2, fW // 2)),
        dimension_numbers=("NCHW", "OIHW", "NCHW"),
        feature_group_count=S,
        precision=jax.lax.Precision.HIGHEST)
    return out.reshape(N, S, out.shape[-2], out.shape[-1])


if __name__ == "__main__":
    key = jax.random.PRNGKey(0)
    k1, k2, k3, k4 = jax.random.split(key, 4)

    num_images, num_sequences = 2, 2
    num_channels, H, W = 16, 16, 16
    fH = fW = 3

    feat = jax.random.normal(
        k1, (num_images, num_sequences, num_channels, H, W), jnp.float32)
    filt = jax.random.normal(
        k2, (num_sequences, num_channels, fH, fW), jnp.float32)

    # deterministic nn.Linear(num_channels, num_channels) parameters
    bound = 1.0 / (num_channels ** 0.5)
    weight = jax.random.uniform(
        k3, (num_channels, num_channels), jnp.float32, -bound, bound)
    bias = jax.random.uniform(k4, (num_channels,), jnp.float32, -bound, bound)

    feat_dtype = _default_feat_dtype()
    scores = linear_filter_classifier_forward(
        feat, filt, weight, bias, project_filter=True, feat_dtype=feat_dtype)
    scores = jax.block_until_ready(scores)

    # Reference uses the same feat rounding so only accumulation order differs.
    feat_ref_in = feat.astype(feat_dtype).astype(jnp.float32)
    ref = _ref_forward(feat_ref_in, filt, weight, bias, project_filter=True)

    assert scores.shape == (num_images, num_sequences, H, W), scores.shape
    max_err = float(jnp.max(jnp.abs(scores - ref)))
    assert jnp.allclose(scores, ref, rtol=5e-3, atol=5e-3), max_err
    print("KERNEL_OK")
</pallas_src>

<mosaic_0001>
module attributes {stable_mosaic.version = 11 : i64} {
  func.func @_filter_classifier_kernel(%arg0: i32, %arg1: memref<1x2x16x256xf32, #tpu.memory_space<vmem>>, %arg2: memref<9x2x16xf32, #tpu.memory_space<vmem>>, %arg3: memref<9x256xf32, #tpu.memory_space<vmem>>, %arg4: memref<1x2x256xf32, #tpu.memory_space<vmem>>) attributes {dimension_semantics = [#tpu.dimension_semantics<parallel>], iteration_bounds = array<i64: 2>, scalar_prefetch = 0 : i64, scratch_operands = 0 : i64, tpu.core_type = #tpu.core_type<tc>, window_params = [{transform_indices = @transform_0, window_bounds = array<i64: 1, 2, 16, 256>}, {pipeline_mode = #tpu.pipeline_mode<synchronous>, transform_indices = @transform_1, window_bounds = array<i64: 9, 2, 16>}, {pipeline_mode = #tpu.pipeline_mode<synchronous>, transform_indices = @transform_2, window_bounds = array<i64: 9, 256>}, {transform_indices = @transform_3, window_bounds = array<i64: 1, 2, 256>}]} {
    %c0 = arith.constant 0 : index
    %c0_0 = arith.constant 0 : index
    %c0_1 = arith.constant 0 : index
    %c0_2 = arith.constant 0 : index
    %0 = vector.load %arg1[%c0, %c0_0, %c0_1, %c0_2] : memref<1x2x16x256xf32, #tpu.memory_space<vmem>>, vector<1x2x16x256xf32>
    %1 = vector.shape_cast %0 : vector<1x2x16x256xf32> to vector<2x16x256xf32>
    %c0_3 = arith.constant 0 : index
    %c0_4 = arith.constant 0 : index
    %c0_5 = arith.constant 0 : index
    %2 = vector.load %arg2[%c0_3, %c0_4, %c0_5] : memref<9x2x16xf32, #tpu.memory_space<vmem>>, vector<9x2x16xf32>
    %cst = arith.constant 0.000000e+00 : f32
    %3 = vector.broadcast %cst : f32 to vector<1x2x256xf32>
    %c17_i32 = arith.constant 17 : i32
    %4 = tpu.dynamic_rotate %1 by %c17_i32 dim 2 : vector<2x16x256xf32>, i32 -> vector<2x16x256xf32>
    %5 = vector.extract_strided_slice %2 {offsets = [0, 0, 0], sizes = [1, 2, 16], strides = [1, 1, 1]} : vector<9x2x16xf32> to vector<1x2x16xf32>
    %6 = vector.shape_cast %5 : vector<1x2x16xf32> to vector<2x16xf32>
    %7 = vector.shape_cast %6 : vector<2x16xf32> to vector<1x2x16x1xf32>
    %8 = vector.shape_cast %4 : vector<2x16x256xf32> to vector<1x2x16x256xf32>
    %9 = vector.broadcast %7 : vector<1x2x16x1xf32> to vector<1x2x16x256xf32>
    %10 = arith.mulf %8, %9 : vector<1x2x16x256xf32>
    %cst_6 = arith.constant dense<0.000000e+00> : vector<1x2x256xf32>
    %11 = vector.multi_reduction <add>, %10, %cst_6 [2] : vector<1x2x16x256xf32> to vector<1x2x256xf32>
    %c0_7 = arith.constant 0 : index
    %c0_8 = arith.constant 0 : index
    %12 = vector.load %arg3[%c0_7, %c0_8] : memref<9x256xf32, #tpu.memory_space<vmem>>, vector<1x256xf32>
    %13 = vector.shape_cast %12 : vector<1x256xf32> to vector<256xf32>
    %14 = vector.shape_cast %13 : vector<256xf32> to vector<1x1x256xf32>
    %15 = vector.broadcast %14 : vector<1x1x256xf32> to vector<1x2x256xf32>
    %16 = arith.mulf %11, %15 : vector<1x2x256xf32>
    %17 = arith.addf %3, %16 : vector<1x2x256xf32>
    %c16_i32 = arith.constant 16 : i32
    %18 = tpu.dynamic_rotate %1 by %c16_i32 dim 2 : vector<2x16x256xf32>, i32 -> vector<2x16x256xf32>
    %19 = vector.extract_strided_slice %2 {offsets = [1, 0, 0], sizes = [1, 2, 16], strides = [1, 1, 1]} : vector<9x2x16xf32> to vector<1x2x16xf32>
    %20 = vector.shape_cast %19 : vector<1x2x16xf32> to vector<2x16xf32>
    %21 = vector.shape_cast %20 : vector<2x16xf32> to vector<1x2x16x1xf32>
    %22 = vector.shape_cast %18 : vector<2x16x256xf32> to vector<1x2x16x256xf32>
    %23 = vector.broadcast %21 : vector<1x2x16x1xf32> to vector<1x2x16x256xf32>
    %24 = arith.mulf %22, %23 : vector<1x2x16x256xf32>
    %cst_9 = arith.constant dense<0.000000e+00> : vector<1x2x256xf32>
    %25 = vector.multi_reduction <add>, %24, %cst_9 [2] : vector<1x2x16x256xf32> to vector<1x2x256xf32>
    %c1 = arith.constant 1 : index
    %c0_10 = arith.constant 0 : index
    %26 = vector.load %arg3[%c1, %c0_10] : memref<9x256xf32, #tpu.memory_space<vmem>>, vector<1x256xf32>
    %27 = vector.shape_cast %26 : vector<1x256xf32> to vector<256xf32>
    %28 = vector.shape_cast %27 : vector<256xf32> to vector<1x1x256xf32>
    %29 = vector.broadcast %28 : vector<1x1x256xf32> to vector<1x2x256xf32>
    %30 = arith.mulf %25, %29 : vector<1x2x256xf32>
    %31 = arith.addf %17, %30 : vector<1x2x256xf32>
    %c15_i32 = arith.constant 15 : i32
    %32 = tpu.dynamic_rotate %1 by %c15_i32 dim 2 : vector<2x16x256xf32>, i32 -> vector<2x16x256xf32>
    %33 = vector.extract_strided_slice %2 {offsets = [2, 0, 0], sizes = [1, 2, 16], strides = [1, 1, 1]} : vector<9x2x16xf32> to vector<1x2x16xf32>
    %34 = vector.shape_cast %33 : vector<1x2x16xf32> to vector<2x16xf32>
    %35 = vector.shape_cast %34 : vector<2x16xf32> to vector<1x2x16x1xf32>
    %36 = vector.shape_cast %32 : vector<2x16x256xf32> to vector<1x2x16x256xf32>
    %37 = vector.broadcast %35 : vector<1x2x16x1xf32> to vector<1x2x16x256xf32>
    %38 = arith.mulf %36, %37 : vector<1x2x16x256xf32>
    %cst_11 = arith.constant dense<0.000000e+00> : vector<1x2x256xf32>
    %39 = vector.multi_reduction <add>, %38, %cst_11 [2] : vector<1x2x16x256xf32> to vector<1x2x256xf32>
    %c2 = arith.constant 2 : index
    %c0_12 = arith.constant 0 : index
    %40 = vector.load %arg3[%c2, %c0_12] : memref<9x256xf32, #tpu.memory_space<vmem>>, vector<1x256xf32>
    %41 = vector.shape_cast %40 : vector<1x256xf32> to vector<256xf32>
    %42 = vector.shape_cast %41 : vector<256xf32> to vector<1x1x256xf32>
    %43 = vector.broadcast %42 : vector<1x1x256xf32> to vector<1x2x256xf32>
    %44 = arith.mulf %39, %43 : vector<1x2x256xf32>
    %45 = arith.addf %31, %44 : vector<1x2x256xf32>
    %c1_i32 = arith.constant 1 : i32
    %46 = tpu.dynamic_rotate %1 by %c1_i32 dim 2 : vector<2x16x256xf32>, i32 -> vector<2x16x256xf32>
    %47 = vector.extract_strided_slice %2 {offsets = [3, 0, 0], sizes = [1, 2, 16], strides = [1, 1, 1]} : vector<9x2x16xf32> to vector<1x2x16xf32>
    %48 = vector.shape_cast %47 : vector<1x2x16xf32> to vector<2x16xf32>
    %49 = vector.shape_cast %48 : vector<2x16xf32> to vector<1x2x16x1xf32>
    %50 = vector.shape_cast %46 : vector<2x16x256xf32> to vector<1x2x16x256xf32>
    %51 = vector.broadcast %49 : vector<1x2x16x1xf32> to vector<1x2x16x256xf32>
    %52 = arith.mulf %50, %51 : vector<1x2x16x256xf32>
    %cst_13 = arith.constant dense<0.000000e+00> : vector<1x2x256xf32>
    %53 = vector.multi_reduction <add>, %52, %cst_13 [2] : vector<1x2x16x256xf32> to vector<1x2x256xf32>
    %c3 = arith.constant 3 : index
    %c0_14 = arith.constant 0 : index
    %54 = vector.load %arg3[%c3, %c0_14] : memref<9x256xf32, #tpu.memory_space<vmem>>, vector<1x256xf32>
    %55 = vector.shape_cast %54 : vector<1x256xf32> to vector<256xf32>
    %56 = vector.shape_cast %55 : vector<256xf32> to vector<1x1x256xf32>
    %57 = vector.broadcast %56 : vector<1x1x256xf32> to vector<1x2x256xf32>
    %58 = arith.mulf %53, %57 : vector<1x2x256xf32>
    %59 = arith.addf %45, %58 : vector<1x2x256xf32>
    %60 = vector.extract_strided_slice %2 {offsets = [4, 0, 0], sizes = [1, 2, 16], strides = [1, 1, 1]} : vector<9x2x16xf32> to vector<1x2x16xf32>
    %61 = vector.shape_cast %60 : vector<1x2x16xf32> to vector<2x16xf32>
    %62 = vector.shape_cast %61 : vector<2x16xf32> to vector<1x2x16x1xf32>
    %63 = vector.shape_cast %1 : vector<2x16x256xf32> to vector<1x2x16x256xf32>
    %64 = vector.broadcast %62 : vector<1x2x16x1xf32> to vector<1x2x16x256xf32>
    %65 = arith.mulf %63, %64 : vector<1x2x16x256xf32>
    %cst_15 = arith.constant dense<0.000000e+00> : vector<1x2x256xf32>
    %66 = vector.multi_reduction <add>, %65, %cst_15 [2] : vector<1x2x16x256xf32> to vector<1x2x256xf32>
    %c4 = arith.constant 4 : index
    %c0_16 = arith.constant 0 : index
    %67 = vector.load %arg3[%c4, %c0_16] : memref<9x256xf32, #tpu.memory_space<vmem>>, vector<1x256xf32>
    %68 = vector.shape_cast %67 : vector<1x256xf32> to vector<256xf32>
    %69 = vector.shape_cast %68 : vector<256xf32> to vector<1x1x256xf32>
    %70 = vector.broadcast %69 : vector<1x1x256xf32> to vector<1x2x256xf32>
    %71 = arith.mulf %66, %70 : vector<1x2x256xf32>
    %72 = arith.addf %59, %71 : vector<1x2x256xf32>
    %c255_i32 = arith.constant 255 : i32
    %73 = tpu.dynamic_rotate %1 by %c255_i32 dim 2 : vector<2x16x256xf32>, i32 -> vector<2x16x256xf32>
    %74 = vector.extract_strided_slice %2 {offsets = [5, 0, 0], sizes = [1, 2, 16], strides = [1, 1, 1]} : vector<9x2x16xf32> to vector<1x2x16xf32>
    %75 = vector.shape_cast %74 : vector<1x2x16xf32> to vector<2x16xf32>
    %76 = vector.shape_cast %75 : vector<2x16xf32> to vector<1x2x16x1xf32>
    %77 = vector.shape_cast %73 : vector<2x16x256xf32> to vector<1x2x16x256xf32>
    %78 = vector.broadcast %76 : vector<1x2x16x1xf32> to vector<1x2x16x256xf32>
    %79 = arith.mulf %77, %78 : vector<1x2x16x256xf32>
    %cst_17 = arith.constant dense<0.000000e+00> : vector<1x2x256xf32>
    %80 = vector.multi_reduction <add>, %79, %cst_17 [2] : vector<1x2x16x256xf32> to vector<1x2x256xf32>
    %c5 = arith.constant 5 : index
    %c0_18 = arith.constant 0 : index
    %81 = vector.load %arg3[%c5, %c0_18] : memref<9x256xf32, #tpu.memory_space<vmem>>, vector<1x256xf32>
    %82 = vector.shape_cast %81 : vector<1x256xf32> to vector<256xf32>
    %83 = vector.shape_cast %82 : vector<256xf32> to vector<1x1x256xf32>
    %84 = vector.broadcast %83 : vector<1x1x256xf32> to vector<1x2x256xf32>
    %85 = arith.mulf %80, %84 : vector<1x2x256xf32>
    %86 = arith.addf %72, %85 : vector<1x2x256xf32>
    %c241_i32 = arith.constant 241 : i32
    %87 = tpu.dynamic_rotate %1 by %c241_i32 dim 2 : vector<2x16x256xf32>, i32 -> vector<2x16x256xf32>
    %88 = vector.extract_strided_slice %2 {offsets = [6, 0, 0], sizes = [1, 2, 16], strides = [1, 1, 1]} : vector<9x2x16xf32> to vector<1x2x16xf32>
    %89 = vector.shape_cast %88 : vector<1x2x16xf32> to vector<2x16xf32>
    %90 = vector.shape_cast %89 : vector<2x16xf32> to vector<1x2x16x1xf32>
    %91 = vector.shape_cast %87 : vector<2x16x256xf32> to vector<1x2x16x256xf32>
    %92 = vector.broadcast %90 : vector<1x2x16x1xf32> to vector<1x2x16x256xf32>
    %93 = arith.mulf %91, %92 : vector<1x2x16x256xf32>
    %cst_19 = arith.constant dense<0.000000e+00> : vector<1x2x256xf32>
    %94 = vector.multi_reduction <add>, %93, %cst_19 [2] : vector<1x2x16x256xf32> to vector<1x2x256xf32>
    %c6 = arith.constant 6 : index
    %c0_20 = arith.constant 0 : index
    %95 = vector.load %arg3[%c6, %c0_20] : memref<9x256xf32, #tpu.memory_space<vmem>>, vector<1x256xf32>
    %96 = vector.shape_cast %95 : vector<1x256xf32> to vector<256xf32>
    %97 = vector.shape_cast %96 : vector<256xf32> to vector<1x1x256xf32>
    %98 = vector.broadcast %97 : vector<1x1x256xf32> to vector<1x2x256xf32>
    %99 = arith.mulf %94, %98 : vector<1x2x256xf32>
    %100 = arith.addf %86, %99 : vector<1x2x256xf32>
    %c240_i32 = arith.constant 240 : i32
    %101 = tpu.dynamic_rotate %1 by %c240_i32 dim 2 : vector<2x16x256xf32>, i32 -> vector<2x16x256xf32>
    %102 = vector.extract_strided_slice %2 {offsets = [7, 0, 0], sizes = [1, 2, 16], strides = [1, 1, 1]} : vector<9x2x16xf32> to vector<1x2x16xf32>
    %103 = vector.shape_cast %102 : vector<1x2x16xf32> to vector<2x16xf32>
    %104 = vector.shape_cast %103 : vector<2x16xf32> to vector<1x2x16x1xf32>
    %105 = vector.shape_cast %101 : vector<2x16x256xf32> to vector<1x2x16x256xf32>
    %106 = vector.broadcast %104 : vector<1x2x16x1xf32> to vector<1x2x16x256xf32>
    %107 = arith.mulf %105, %106 : vector<1x2x16x256xf32>
    %cst_21 = arith.constant dense<0.000000e+00> : vector<1x2x256xf32>
    %108 = vector.multi_reduction <add>, %107, %cst_21 [2] : vector<1x2x16x256xf32> to vector<1x2x256xf32>
    %c7 = arith.constant 7 : index
    %c0_22 = arith.constant 0 : index
    %109 = vector.load %arg3[%c7, %c0_22] : memref<9x256xf32, #tpu.memory_space<vmem>>, vector<1x256xf32>
    %110 = vector.shape_cast %109 : vector<1x256xf32> to vector<256xf32>
    %111 = vector.shape_cast %110 : vector<256xf32> to vector<1x1x256xf32>
    %112 = vector.broadcast %111 : vector<1x1x256xf32> to vector<1x2x256xf32>
    %113 = arith.mulf %108, %112 : vector<1x2x256xf32>
    %114 = arith.addf %100, %113 : vector<1x2x256xf32>
    %c239_i32 = arith.constant 239 : i32
    %115 = tpu.dynamic_rotate %1 by %c239_i32 dim 2 : vector<2x16x256xf32>, i32 -> vector<2x16x256xf32>
    %116 = vector.extract_strided_slice %2 {offsets = [8, 0, 0], sizes = [1, 2, 16], strides = [1, 1, 1]} : vector<9x2x16xf32> to vector<1x2x16xf32>
    %117 = vector.shape_cast %116 : vector<1x2x16xf32> to vector<2x16xf32>
    %118 = vector.shape_cast %117 : vector<2x16xf32> to vector<1x2x16x1xf32>
    %119 = vector.shape_cast %115 : vector<2x16x256xf32> to vector<1x2x16x256xf32>
    %120 = vector.broadcast %118 : vector<1x2x16x1xf32> to vector<1x2x16x256xf32>
    %121 = arith.mulf %119, %120 : vector<1x2x16x256xf32>
    %cst_23 = arith.constant dense<0.000000e+00> : vector<1x2x256xf32>
    %122 = vector.multi_reduction <add>, %121, %cst_23 [2] : vector<1x2x16x256xf32> to vector<1x2x256xf32>
    %c8 = arith.constant 8 : index
    %c0_24 = arith.constant 0 : index
    %123 = vector.load %arg3[%c8, %c0_24] : memref<9x256xf32, #tpu.memory_space<vmem>>, vector<1x256xf32>
    %124 = vector.shape_cast %123 : vector<1x256xf32> to vector<256xf32>
    %125 = vector.shape_cast %124 : vector<256xf32> to vector<1x1x256xf32>
    %126 = vector.broadcast %125 : vector<1x1x256xf32> to vector<1x2x256xf32>
    %127 = arith.mulf %122, %126 : vector<1x2x256xf32>
    %128 = arith.addf %114, %127 : vector<1x2x256xf32>
    %c0_25 = arith.constant 0 : index
    %c0_26 = arith.constant 0 : index
    %c0_27 = arith.constant 0 : index
    %129 = vector.load %arg4[%c0_25, %c0_26, %c0_27] : memref<1x2x256xf32, #tpu.memory_space<vmem>>, vector<1x2x256xf32>
    tpu.vector_store %arg4[%c0_25, %c0_26, %c0_27], %128 {strides = array<i32>} : memref<1x2x256xf32, #tpu.memory_space<vmem>>, vector<1x2x256xf32>,
    return
  }
  func.func @transform_0(%arg0: i32) -> (i32, i32, i32, i32) {
    %c0_i32 = arith.constant 0 : i32
    %c0_i32_0 = arith.constant 0 : i32
    %c0_i32_1 = arith.constant 0 : i32
    %c0_i32_2 = arith.constant 0 : i32
    return %arg0, %c0_i32, %c0_i32_0, %c0_i32_1 : i32, i32, i32, i32
  }
  func.func @transform_1(%arg0: i32) -> (i32, i32, i32) {
    %c0_i32 = arith.constant 0 : i32
    %c0_i32_0 = arith.constant 0 : i32
    %c0_i32_1 = arith.constant 0 : i32
    %c0_i32_2 = arith.constant 0 : i32
    return %c0_i32, %c0_i32_0, %c0_i32_1 : i32, i32, i32
  }
  func.func @transform_2(%arg0: i32) -> (i32, i32) {
    %c0_i32 = arith.constant 0 : i32
    %c0_i32_0 = arith.constant 0 : i32
    %c0_i32_1 = arith.constant 0 : i32
    return %c0_i32, %c0_i32_0 : i32, i32
  }
  func.func @transform_3(%arg0: i32) -> (i32, i32, i32) {
    %c0_i32 = arith.constant 0 : i32
    %c0_i32_0 = arith.constant 0 : i32
    %c0_i32_1 = arith.constant 0 : i32
    return %arg0, %c0_i32, %c0_i32_0 : i32, i32, i32
  }
}

</mosaic_0001>

<bundles_post_ra>
// kernel: tpu_custom_call.1
= control target key start
LH: loop header
LB: loop body
LE: loop exit
PB: predicated region body
PF: predicated region fallthrough
CT: control target
= control target key end

     0   :  { %8 = vsyncpa [#allocation3], 0  ;;  %s2309_s0 = inlined_call_operand.hbm [shape: f32[2,2,16,256], index: 0, kind: input, shape index: {}]   ;;  %s2310_s1 = inlined_call_operand.hbm [shape: f32[9,2,16], index: 1, kind: input, shape index: {}]   ;;  %s2311_s2 = inlined_call_operand.hbm [shape: f32[9,256], index: 2, kind: input, shape index: {}]   ;;  %s2312_s3 = inlined_call_operand.hbm [shape: f32[2,2,256], index: 3, kind: output, shape index: {}]  }
   0x1   :  { %10 = vsyncpa [#allocation3 + $0x1], 0 }
   0x2   :  { %11 = vsyncpa [#allocation6], 0 }
   0x3   :  { %12 = vsyncpa [#allocation4], 0 }
   0x4   :  { %14 = vsyncpa [#allocation4 + $0x1], 0  ;;  %s1583_s12 = smov 0   ;;  %s1585_s13 = smov 0  }
   0x5   :  { %s1587_s14 = smov 0   ;;  %s1589_s15 = smov 0  }
   0x6 LB: > { %s1604_s16 = sadd.s32 4294967295, %s1547_s15   ;;  %s1265_s17 = sadd.s32 4294967294, %s1547_s15   ;;  %s1547_s15 = sphi %s1589_s15, %s2328_s15   ;;  %s1543_s14 = sphi %s1587_s14, %s2327_s14   ;;  %s1539_s13 = sphi %s1585_s13, %s2326_s13   ;;  %s1535_s12 = sphi %s1583_s12, %s2325_s12  }
   0x7   : > { %p40_p0 = scmp.ne.s32.totalorder %s1539_s13, %s1535_s12  ;;  %p41_p1 = scmp.eq.s32.totalorder %s1604_s16, 0 }
   0x8   : > { %p106_p2 = scmp.eq.s32.totalorder %s1604_s16, 1  ;;  %p112_p3 = scmp.eq.s32.totalorder %s1265_s17, 1 }
   0x9   : > { %p1613_p4 = por %p41_p1, %p40_p0  ;;  %p1266_p5 = scmp.ge.s32.totalorder %s1547_s15, 1 }
   0xa   : > { %p1618_p6 = por %p112_p3, %p40_p0  ;;  %p119_p7 = scmp.lt.s32.totalorder %s1547_s15, 3 }
   0xb   : > { %s130_s22 = sshll.u32 %s2310_s1, 4  ;;  %s1549_s24 = smov [#allocation5]   ;;  %s131_s22 = int_to_ptr.hbm [resolvable:$true] %s130_s22 }
   0xc   : > { %p1626_p8 = pnand %p1266_p5, %p119_p7  ;;  %s132_s25 = sshll.u32 %s1549_s24, 4  ;;  %s133_s25 = int_to_ptr.vmem [resolvable:$true] %s132_s25 }
   0xd   : > { %s144_s28 = sshll.u32 %s2311_s2, 4  ;;  %s1550_s29 = smov 32   ;;  %s145_s28 = int_to_ptr.hbm [resolvable:$true] %s144_s28 }
   0xe   : > { %p1297_p9 = pneg %p1626_p8  ;;  %s1551_s30 = smov 2  }
   0xf   : > { %s1552_s4 = smov [#allocation7]   ;;  %s1553_s6 = smov 256  }
  0x10   : > { %p1298_p10 = pnand %p1297_p9, %p41_p1  ;;  %s146_s5 = sshll.u32 %s1552_s4, 4  ;;  %s147_s5 = int_to_ptr.vmem [resolvable:$true] %s146_s5 }
  0x11   : > { %s1554_s7 = smov 16   ;;  %s1642_s8 = sadd.s32 1, %s1547_s15  }
  0x12   : > { %1300 = dma.hbm_to_vmem [thread:$0]  (!%p1298_p10), %s131_s22, 288, %s133_s25, [#allocation6], %s1550_s29, %s1550_s29, %s1551_s30  }
  0x13   : > { %1303 = dma.hbm_to_vmem [thread:$0]  (!%p1298_p10), %s145_s28, 512, %s147_s5, [#allocation6], %s1553_s6, %s1553_s6, %s1554_s7  }
  0x14   : > { %s24_s9 = ssub.s32 %s1547_s15, %s1642_s8  ;;  %s27_s10 = sadd.s32 1, %s1543_s14 }
  0x15   : > { %p25_p12 = scmp.eq.s32.totalorder %s24_s9, 0  ;;  %p34_p13 = scmp.ne.s32.totalorder %s1543_s14, %s1539_s13 }
  0x16   : > { %p35_p0 = scmp.eq.s32.totalorder %s1547_s15, 0  ;;  %p1314_p7 = scmp.lt.s32.totalorder %s1547_s15, 2 }
  0x17   : > { %s1651_s11 = scalar_select %p25_p12, %s1543_s14, %s27_s10  }
  0x18   : > { %p36_p3 = por %p35_p0, %p34_p13  ;;  %p1655_p5 = por %p106_p2, %p34_p13 }
  0x19   : > { %s160_s20 = sand.u32 1, %s1543_s14   ;;  %s1283_s22 = sshll.u32 %s1547_s15, 6 }
  0x1a   : > { %s1270_s21 = sshll.u32 %s160_s20, 6  ;;  %s169_s26 = scalar_lea.hbm %s2309_s0, %s1283_s22 }
  0x1b   : > { %s164_s27 = scalar_lea.vmem [#allocation2], %s1270_s21  ;;  %s170_s29 = sshll.u32 %s169_s26, 4  ;;  %s171_s29 = int_to_ptr.hbm [resolvable:$true] %s170_s29 }
  0x1c   : > { %s172_s28 = sshll.u32 %s164_s27, 4  ;;  %p1665_p9 = pnand %p1314_p7, %p36_p3  ;;  %s173_s28 = int_to_ptr.vmem [resolvable:$true] %s172_s28 }
  0x1d   : > { %s161_s4 = scalar_lea.sflag [#allocation3], %s160_s20  ;;  %s1447_s5 = sshra.s32 %s171_s29, 4  ;;  %s1448_s5 = int_to_ptr.hbm [resolvable:$true] %s1447_s5 }
  0x1e   : > { %s1449_s9 = scalar_lea.hbm %s1448_s5, 64  ;;  %p1451_p10 = pneg %p1665_p9 }
  0x1f   : > { %p1450_p2 = scmp.ne.s32.totalorder %s1448_s5, %s1449_s9  ;;  %s1454_s22 = scalar_lea.hbm %s2309_s0, 128 }
  0x20   : > { %p1455_p0 = scmp.lt.s32.totalorder %s1448_s5, %s2309_s0  ;;  %p1456_p3 = scmp.lt.s32.totalorder %s1454_s22, %s1449_s9 }
  0x21   : > { %p1452_p12 = pnand %p1451_p10, %p1450_p2 }
  0x22   : > { %p1457_p7 = por %p1456_p3, %p1455_p0 }
  0x23   : > { %p1453_p13 = pneg %p1452_p12 }
  0x25   : > { %p1458_p11 = pnand %p1457_p7, %p1453_p13 }
  0x27   : > { %1461 = shalt.err (!%p1458_p11)
}
  0x28   : > { %1307 = dma.hbm_to_vmem [thread:$0]  (!%p1665_p9), %s171_s29, 1024, %s173_s28, %s161_s4, %s1553_s6, %s1553_s6, %s1554_s7  }
  0x29   : > { %184 = sbr.rel (%p1626_p8) target bundleno = 499 (0x1f3), region = 32  ;;  %s1685_s20 = sand.u32 (!%p1626_p8), 1, %s1539_s13  }
  0x2a   : > { %s1274_s26 = sshll.u32 (!%p1626_p8), %s1685_s20, 6  ;;  %s187_s27 = scalar_lea.sflag (!%p1626_p8), [#allocation3], %s1685_s20 }
  0x2b   : > { %s190_s5 = scalar_lea.vmem (!%p1626_p8), [#allocation2], %s1274_s26 }
  0x2e   : > { %1522 = dma.done.wait (%p1613_p4), %s187_s27, 1024  }
  0x2f   : > { %1524 = vsyncadd (%p1613_p4), %s187_s27, 4294966272 }
  0x30   : > { %1526 = dma.done.wait (%p41_p1), [#allocation6], 800  }
  0x31   : > { %1528 = vsyncadd (%p41_p1), [#allocation6], 4294966496  ;;  %v257_v0 = vlaneseq  ;;  %v1703_v2 = vld [vmem:[%s190_s5 + $0x20] sm:$0xff]  ;;  %v1705_v3 = vld [vmem:[%s190_s5 + $0x8] sm:$0xff]  ;;  %s1555_s18 = smov 17   ;;  %s1556_s23 = smov 16  }
  0x32   : > { %v1707_v4 = vld [vmem:[%s190_s5] sm:$0xff]  ;;  %245 = vrot.lane.b32.xlu1 %v1703_v2, %s1555_s18  ;;  %249 = vrot.lane.b32.xlu2 %v1705_v3, %s1555_s18  ;;  %v1712_v5 = vld [vmem:[%s190_s5 + $0x30] sm:$0xff]  ;;  %s1557_s6 = smov 15   ;;  %s1558_s7 = smov 1   ;;  %v1791_v34 = vld [vmem:[#allocation5 + $0xa] sm:$0x3] }
  0x33   : > { %v1698_v1 = vshrl.u32 %v257_v0, 7  ;;  %241 = vrot.lane.b32.xlu0 %v1707_v4, %s1555_s18  ;;  %v1714_v6 = vld [vmem:[%s190_s5 + $0x18] sm:$0xff]  ;;  %v1716_v7 = vld [vmem:[%s190_s5 + $0x10] sm:$0xff]  ;;  %v1721_v8 = vld [vmem:[#allocation5] sm:$0x3]  ;;  %v1767_v24 = vand.u32 127, %v257_v0 }
  0x34   : > { %v268_v9 = vperm.slane %v1721_v8, 0  ;;  %v1724_v10 = vld [vmem:[%s190_s5 + $0x38] sm:$0xff]  ;;  %v1726_v11 = vld [vmem:[%s190_s5 + $0x28] sm:$0xff]  ;;  %v281_v12 = vperm.slane %v1721_v8, 1  ;;  %v233_v14 = vld [vmem:[#allocation5 + $0x2] sm:$0x3] }
  0x35   : > { %1364 = vset.pattern.permute.xlu2 %v1698_v1  ;;  %1365 = vset.pattern.permute.xlu1 %v1698_v1  ;;  %v1734_v13 = vadd.s32 8, %v1698_v1  ;;  %v369_v15 = vperm.slane %v233_v14, 0  ;;  %v382_v16 = vperm.slane %v233_v14, 1  ;;  %v234_v17 = vld [vmem:[#allocation5 + $0x4] sm:$0x3]  ;;  %s1559_s28 = smov 127  }
  0x36   : > { %1367 = vset.pattern.permute.xlu0 %v1698_v1  ;;  %v484_v18 = vperm.slane %v234_v17, 1  ;;  %v471_v19 = vperm.slane %v234_v17, 0  ;;  %v235_v21 = vld [vmem:[#allocation5 + $0x6] sm:$0x3]  ;;  %vm259_vm0 = vcmp.lt.s32.totalorder %v1767_v24, 17  ;;  %v752_v39 = vperm.slane %v1791_v34, 0 }
  0x37   : > { %v586_v22 = vperm.slane %v235_v21, 1  ;;  %v573_v38 = vperm.slane %v235_v21, 0  ;;  %s1560_s29 = smov 113   ;;  %v1816_v49 = vld [vmem:[#allocation5 + $0x8] sm:$0x3]  ;;  %vm360_vm1 = vcmp.lt.s32.totalorder %v1767_v24, 16 }
  0x38   : > { %v650_v55 = vperm.slane %v1816_v49, 0  ;;  %v663_v21 = vperm.slane %v1816_v49, 1  ;;  %vm462_vm2 = vcmp.lt.s32.totalorder %v1767_v24, 15  ;;  %s1561_s30 = smov 112   ;;  %vm564_vm3 = vcmp.lt.s32.totalorder %v1767_v24, 1  ;;  %s1562_s4 = smov 111  }
  0x39   : > { %vm743_vm4 = vcmp.lt.s32.totalorder %v1767_v24, 127  ;;  %vm845_vm5 = vcmp.lt.s32.totalorder %v1767_v24, 113  ;;  %vm947_vm6 = vcmp.lt.s32.totalorder %v1767_v24, 112  ;;  %vm1049_vm7 = vcmp.lt.s32.totalorder %v1767_v24, 111  ;;  %s1277_s9 = sshll.u32 %s1685_s20, 2  ;;  %s1284_s10 = sshll.u32 %s1604_s16, 2 }
  0x3a   : > { %247 = vrot.lane.b32.xlu1 %v1712_v5, %s1555_s18  ;;  %251 = vrot.lane.b32.xlu2 %v1714_v6, %s1555_s18  ;;  %vm1141_vm8 = vcmask 1041408   ;;  %s1171_s24 = scalar_lea.hbm %s2312_s3, %s1284_s10  ;;  %vm1149_vm9 = vcmask 1041409   ;;  %vm1151_vm10 = vcmask 1043459   ;;  %vm1153_vm11 = vcmask 1045509   ;;  %s223_s25 = scalar_lea.vmem [#allocation8], %s1277_s9 }
  0x3b   : > { %243 = vrot.lane.b32.xlu0 %v1716_v7, %s1555_s18  ;;  %s1173_s26 = sshll.u32 %s223_s25, 4  ;;  %s1175_s16 = sshll.u32 %s1171_s24, 4  ;;  %vm1155_vm12 = vcmask 1047559   ;;  %s1174_s26 = int_to_ptr.vmem [resolvable:$true] %s1173_s26  ;;  %s1176_s16 = int_to_ptr.hbm [resolvable:$true] %s1175_s16 }
  0x3c   : > { %s1160_s27 = scalar_lea.sflag [#allocation4], %s1685_s20  ;;  %s1491_s5 = sshra.s32 %s1176_s16, 4  ;;  %s1492_s5 = int_to_ptr.hbm [resolvable:$true] %s1491_s5 }
  0x3d   : > { %p1498_p11 = scmp.lt.s32.totalorder %s1492_s5, %s2312_s3 }
  0x42   : > { %255 = vrot.lane.b32.xlu1 %v1724_v10, %s1555_s18  ;;  %273 = vperm.xlu2 %1364, %v268_v9  }
  0x43   : > { %253 = vrot.lane.b32.xlu0 %v1726_v11, %s1555_s18  ;;  %s1493_s18 = scalar_lea.hbm %s1492_s5, 4 }
  0x44   : > { %p1494_p1 = scmp.ne.s32.totalorder %s1492_s5, %s1493_s18 }
  0x46   : > { %p1495_p4 = pnand %p1494_p1, %p1655_p5 }
  0x48   : > { %p1496_p8 = pneg %p1495_p4 }
  0x4a   : > { %286 = vperm.xlu1 %1365, %v281_v12   ;;  %1366 = vset.pattern.permute.xlu2 %v1734_v13 }
  0x4b   : > { %348 = vrot.lane.b32.xlu0 %v1703_v2, %s1556_s23 }
  0x52   : > { %292 = vperm.xlu2 %1366, %v281_v12   ;;  %344 = vrot.lane.b32.xlu1 %v1707_v4, %s1556_s23 }
  0x53   : > { %354 = vrot.lane.b32.xlu0 %v1714_v6, %s1556_s23  ;;  %1368 = vset.pattern.permute.xlu1 %v1734_v13 }
  0x5a   : > { %346 = vrot.lane.b32.xlu2 %v1716_v7, %s1556_s23  ;;  %350 = vrot.lane.b32.xlu1 %v1712_v5, %s1556_s23 }
  0x5b   : > { %374 = vperm.xlu0 %1367, %v369_v15   ;;  %1369 = vset.pattern.permute.xlu2 %v1698_v1 }
  0x62   : > { %352 = vrot.lane.b32.xlu2 %v1705_v3, %s1556_s23  ;;  %356 = vrot.lane.b32.xlu1 %v1726_v11, %s1556_s23 }
  0x63   : > { %448 = vrot.lane.b32.xlu0 %v1716_v7, %s1557_s6 }
  0x6a   : > { %358 = vrot.lane.b32.xlu2 %v1724_v10, %s1556_s23  ;;  %380 = vperm.xlu1 %1368, %v369_v15   ;;  %v1836_v15 = vld [vmem:[#allocation5 + $0xc] sm:$0x3] }
  0x6b   : > { %454 = vrot.lane.b32.xlu0 %v1705_v3, %s1557_s6 }
  0x72   : > { %387 = vperm.xlu2 %1369, %v382_v16   ;;  %393 = vperm.xlu1 %1368, %v382_v16  }
  0x73   : > { %460 = vrot.lane.b32.xlu0 %v1724_v10, %s1557_s6 }
  0x7a   : > { %446 = vrot.lane.b32.xlu2 %v1707_v4, %s1557_s6  ;;  %450 = vrot.lane.b32.xlu1 %v1703_v2, %s1557_s6 }
  0x7b   : > { %489 = vperm.xlu0 %1367, %v484_v18   ;;  %1370 = vset.pattern.permute.xlu1 %v1698_v1 }
  0x7c   : > { %1371 = vset.pattern.permute.xlu2 %v1734_v13 }
  0x82   : > { %452 = vrot.lane.b32.xlu2 %v1712_v5, %s1557_s6  ;;  %456 = vrot.lane.b32.xlu1 %v1714_v6, %s1557_s6 }
  0x83   : > { %550 = vrot.lane.b32.xlu0 %v1716_v7, %s1558_s7 }
  0x8a   : > { %458 = vrot.lane.b32.xlu2 %v1726_v11, %s1557_s6  ;;  %476 = vperm.xlu1 %1370, %v471_v19  }
  0x8b   : > { %556 = vrot.lane.b32.xlu0 %v1705_v3, %s1558_s7 }
  0x8c   : > { %v250_v20 = vpop.permute.xlu2 %249 }
  0x92   : > { %482 = vperm.xlu2 %1371, %v471_v19   ;;  %1372 = vset.pattern.permute.xlu1 %v1734_v13 }
  0x93   : > { %562 = vrot.lane.b32.xlu0 %v1724_v10, %s1558_s7 }
  0x94   : > { %v252_v23 = vpop.permute.xlu2 %251 }
  0x9a   : > { %548 = vrot.lane.b32.xlu2 %v1707_v4, %s1558_s7  ;;  %495 = vperm.xlu1 %1372, %v484_v18  }
  0x9b   : > { %591 = vperm.xlu0 %1367, %v586_v22  }
  0x9c   : > { %v274_v25 = vpop.permute.xlu2 %273 }
  0xa2   : > { %554 = vrot.lane.b32.xlu2 %v1712_v5, %s1558_s7  ;;  %552 = vrot.lane.b32.xlu1 %v1703_v2, %s1558_s7 }
  0xa3   : > { %731 = vrot.lane.b32.xlu0 %v1703_v2, %s1559_s28  ;;  %1373 = vset.pattern.permute.xlu1 %v1698_v1 }
  0xa4   : > { %v246_v26 = vpop.permute.xlu1 %245 }
  0xa5   : > { %v242_v27 = vpop.permute.xlu0 %241 }
  0xa6   : > { %v260_v28 = vsel %vm259_vm0, %v242_v27, %v250_v20  ;;  %v264_v29 = vsel %vm259_vm0, %v250_v20, %v242_v27 }
  0xa7   : > { %v1781_v30 = vmul.f32 %v274_v25, %v264_v29  ;;  %v1783_v31 = vmul.f32 %v274_v25, %v260_v28 }
  0xaa   : > { %560 = vrot.lane.b32.xlu2 %v1726_v11, %s1558_s7  ;;  %558 = vrot.lane.b32.xlu1 %v1714_v6, %s1558_s7  ;;  %s1497_s7 = scalar_lea.hbm %s2312_s3, 8 }
  0xab   : > { %737 = vrot.lane.b32.xlu0 %v1714_v6, %s1559_s28  ;;  %p1499_p9 = scmp.lt.s32.totalorder %s1497_s7, %s1493_s18 }
  0xac   : > { %v248_v32 = vpop.permute.xlu1 %247  ;;  %v293_v33 = vpop.permute.xlu2 %292 }
  0xad   : > { %v244_v35 = vpop.permute.xlu0 %243  ;;  %p1500_p2 = por %p1499_p9, %p1498_p11 }
  0xae   : > { %v1795_v36 = vsel %vm259_vm0, %v244_v35, %v252_v23  ;;  %v1799_v37 = vsel %vm259_vm0, %v252_v23, %v244_v35 }
  0xaf   : > { %p1501_p10 = pnand %p1500_p2, %p1496_p8 }
  0xb2   : > { %584 = vperm.xlu2 %1371, %v573_v38   ;;  %578 = vperm.xlu1 %1373, %v573_v38  }
  0xb3   : > { %757 = vperm.xlu0 %1367, %v752_v39  }
  0xb4   : > { %v256_v40 = vpop.permute.xlu1 %255  ;;  %v347_v41 = vpop.permute.xlu2 %346 }
  0xb5   : > { %v263_v42 = vsel %vm259_vm0, %v248_v32, %v256_v40  ;;  %v267_v43 = vsel %vm259_vm0, %v256_v40, %v248_v32  ;;  %v254_v44 = vpop.permute.xlu0 %253 }
  0xb6   : > { %v300_v45 = vmul.f32 %v293_v33, %v267_v43  ;;  %v301_v46 = vmul.f32 %v293_v33, %v263_v42  ;;  %v262_v47 = vsel %vm259_vm0, %v246_v26, %v254_v44  ;;  %v266_v48 = vsel %vm259_vm0, %v254_v44, %v246_v26 }
  0xba   : > { %1374 = vset.pattern.permute.xlu1 %v1734_v13  ;;  %1375 = vset.pattern.permute.xlu2 %v1698_v1 }
  0xbb   : > { %831 = vrot.lane.b32.xlu0 %v1716_v7, %s1560_s29 }
  0xbc   : > { %v287_v50 = vpop.permute.xlu1 %286  ;;  %v353_v51 = vpop.permute.xlu2 %352 }
  0xbd   : > { %v298_v52 = vmul.f32 %v287_v50, %v266_v48  ;;  %v299_v53 = vmul.f32 %v287_v50, %v262_v47  ;;  %v349_v54 = vpop.permute.xlu0 %348 }
  0xbf   : > { %v316_v56 = vadd.f32 %v300_v45, %v298_v52  ;;  %v323_v57 = vadd.f32 %v301_v46, %v299_v53 }
  0xc1   : > { %v317_v33 = vrot.slane %v316_v56, 4  ;;  %v324_v35 = vrot.slane %v323_v57, 4 }
  0xc2   : > { %597 = vperm.xlu1 %1374, %v586_v22   ;;  %655 = vperm.xlu2 %1375, %v650_v55   ;;  %v867_v22 = vperm.slane %v1836_v15, 1 }
  0xc3   : > { %837 = vrot.lane.b32.xlu0 %v1705_v3, %s1560_s29  ;;  %v318_v48 = vadd.f32 %v317_v33, %v316_v56  ;;  %v325_v50 = vadd.f32 %v324_v35, %v323_v57 }
  0xc4   : > { %v359_v58 = vpop.permute.xlu2 %358  ;;  %v345_v59 = vpop.permute.xlu1 %344 }
  0xc5   : > { %v361_v60 = vsel %vm360_vm1, %v345_v59, %v353_v51  ;;  %v365_v61 = vsel %vm360_vm1, %v353_v51, %v345_v59  ;;  %v355_v62 = vpop.permute.xlu0 %354  ;;  %v319_v51 = vrot.slane %v318_v48, 2  ;;  %v326_v52 = vrot.slane %v325_v50, 2 }
  0xc6   : > { %v362_v63 = vsel %vm360_vm1, %v347_v41, %v355_v62  ;;  %v366_v0 = vsel %vm360_vm1, %v355_v62, %v347_v41 }
  0xc7   : > { %v327_v8 = vadd.f32 %v326_v52, %v325_v50 }
  0xca   : > { %1376 = vset.pattern.permute.xlu1 %v1698_v1  ;;  %1377 = vset.pattern.permute.xlu2 %v1734_v13 }
  0xcb   : > { %843 = vrot.lane.b32.xlu0 %v1724_v10, %s1560_s29 }
  0xcc   : > { %v388_v12 = vpop.permute.xlu2 %387  ;;  %v351_v14 = vpop.permute.xlu1 %350 }
  0xcd   : > { %v364_v16 = vsel %vm360_vm1, %v351_v14, %v359_v58  ;;  %v368_v17 = vsel %vm360_vm1, %v359_v58, %v351_v14  ;;  %v375_v18 = vpop.permute.xlu0 %374 }
  0xce   : > { %v395_v19 = vmul.f32 %v375_v18, %v365_v61  ;;  %v396_v20 = vmul.f32 %v375_v18, %v361_v60  ;;  %v328_v18 = vrot.slane %v327_v8, 1 }
  0xd2   : > { %668 = vperm.xlu1 %1376, %v663_v21   ;;  %674 = vperm.xlu2 %1377, %v663_v21  }
  0xd3   : > { %872 = vperm.xlu0 %1367, %v867_v22  }
  0xd4   : > { %v447_v23 = vpop.permute.xlu2 %446  ;;  %v357_v25 = vpop.permute.xlu1 %356 }
  0xd5   : > { %v363_v26 = vsel %vm360_vm1, %v349_v54, %v357_v25  ;;  %v367_v27 = vsel %vm360_vm1, %v357_v25, %v349_v54  ;;  %v1850_v28 = vpop.permute.xlu0 %448 }
  0xd6   : > { %v399_v29 = vmul.f32 %v388_v12, %v367_v27  ;;  %v400_v32 = vmul.f32 %v388_v12, %v363_v26  ;;  %v1890_v12 = vld [vmem:[#allocation7] ss:$8 sm:$0x3] }
  0xd7   : > { %v332_v25 = vperm.slane %v1890_v12, 0  ;;  %v333_v49 = vperm.slane %v1890_v12, 1 }
  0xda   : > { %727 = vrot.lane.b32.xlu1 %v1707_v4, %s1559_s28  ;;  %729 = vrot.lane.b32.xlu2 %v1716_v7, %s1559_s28 }
  0xdb   : > { %1382 = vset.pattern.permute.xlu0 %v1734_v13  ;;  %1378 = vset.pattern.permute.xlu1 %v1734_v13 }
  0xdc   : > { %v381_v38 = vpop.permute.xlu1 %380  ;;  %1379 = vset.pattern.permute.xlu2 %v1698_v1  ;;  %v453_v40 = vpop.permute.xlu2 %452 }
  0xdd   : > { %v397_v41 = vmul.f32 %v381_v38, %v366_v0  ;;  %v398_v42 = vmul.f32 %v381_v38, %v362_v63  ;;  %v455_v43 = vpop.permute.xlu0 %454  ;;  %v320_v63 = vadd.f32 %v319_v51, %v318_v48  ;;  %v329_v38 = vadd.f32 %v328_v18, %v327_v8 }
  0xde   : > { %v1862_v44 = vsel %vm462_vm2, %v447_v23, %v455_v43  ;;  %v1866_v45 = vsel %vm462_vm2, %v455_v43, %v447_v23 }
  0xdf   : > { %v1868_v46 = vadd.f32 %v397_v41, %v395_v19  ;;  %v1870_v47 = vadd.f32 %v398_v42, %v396_v20  ;;  %v765_v41 = vperm.slane %v1791_v34, 1 }
  0xe2   : > { %733 = vrot.lane.b32.xlu1 %v1712_v5, %s1559_s28  ;;  %735 = vrot.lane.b32.xlu2 %v1705_v3, %s1559_s28 }
  0xe3   : > { %279 = vperm.xlu0 %1382, %v268_v9  }
  0xe4   : > { %v394_v53 = vpop.permute.xlu1 %393  ;;  %v459_v57 = vpop.permute.xlu2 %458 }
  0xe5   : > { %v401_v54 = vmul.f32 %v394_v53, %v368_v17  ;;  %v402_v58 = vmul.f32 %v394_v53, %v364_v16  ;;  %v461_v59 = vpop.permute.xlu0 %460  ;;  %v321_v17 = vrot.slane %v320_v63, 1 }
  0xe6   : > { %v1880_v60 = vsel %vm462_vm2, %v453_v40, %v461_v59  ;;  %v1884_v56 = vsel %vm462_vm2, %v461_v59, %v453_v40  ;;  %v1900_v40 = vld [vmem:[#allocation7 + $0x1] ss:$8 sm:$0x3] }
  0xe7   : > { %v417_v61 = vadd.f32 %v401_v54, %v399_v29  ;;  %v424_v62 = vadd.f32 %v402_v58, %v400_v32  ;;  %v434_v50 = vperm.slane %v1900_v40, 0  ;;  %v435_v51 = vperm.slane %v1900_v40, 1 }
  0xe8   : > { %v339_v58 = vmul.f32 %v333_v49, %v329_v38 }
  0xe9   : > { %v418_v9 = vrot.slane %v417_v61, 4  ;;  %v425_v0 = vrot.slane %v424_v62, 4 }
  0xea   : > { %739 = vrot.lane.b32.xlu1 %v1726_v11, %s1559_s28  ;;  %741 = vrot.lane.b32.xlu2 %v1724_v10, %s1559_s28 }
  0xeb   : > { %v419_v14 = vadd.f32 %v418_v9, %v417_v61  ;;  %v426_v16 = vadd.f32 %v425_v0, %v424_v62  ;;  %661 = vperm.xlu0 %1382, %v650_v55   ;;  %v322_v55 = vadd.f32 %v321_v17, %v320_v63 }
  0xec   : > { %v451_v19 = vpop.permute.xlu1 %450  ;;  %v483_v48 = vpop.permute.xlu2 %482 }
  0xed   : > { %v420_v20 = vrot.slane %v419_v14, 2  ;;  %v427_v21 = vrot.slane %v426_v16, 2  ;;  %v490_v23 = vpop.permute.xlu0 %489  ;;  %v465_v26 = vsel %vm462_vm2, %v451_v19, %v459_v57  ;;  %v469_v27 = vsel %vm462_vm2, %v459_v57, %v451_v19 }
  0xee   : > { %v501_v33 = vmul.f32 %v490_v23, %v469_v27  ;;  %v502_v35 = vmul.f32 %v490_v23, %v465_v26  ;;  %v338_v54 = vmul.f32 %v332_v25, %v322_v55 }
  0xef   : > { %v421_v29 = vadd.f32 %v420_v20, %v419_v14  ;;  %v428_v32 = vadd.f32 %v427_v21, %v426_v16 }
  0xf1   : > { %v422_v42 = vrot.slane %v421_v29, 1  ;;  %v429_v43 = vrot.slane %v428_v32, 1 }
  0xf2   : > { %763 = vperm.xlu1 %1378, %v752_v39   ;;  %770 = vperm.xlu2 %1379, %v765_v41  }
  0xf3   : > { %v423_v52 = vadd.f32 %v422_v42, %v421_v29  ;;  %v430_v53 = vadd.f32 %v429_v43, %v428_v32  ;;  %933 = vrot.lane.b32.xlu0 %v1716_v7, %s1561_s30  ;;  %v854_v43 = vperm.slane %v1836_v15, 0 }
  0xf4   : > { %v457_v59 = vpop.permute.xlu1 %456  ;;  %v549_v14 = vpop.permute.xlu2 %548 }
  0xf5   : > { %v440_v34 = vmul.f32 %v434_v50, %v423_v52  ;;  %v441_v39 = vmul.f32 %v435_v51, %v430_v53  ;;  %v464_v57 = vsel %vm462_vm2, %v1850_v28, %v457_v59  ;;  %v468_v61 = vsel %vm462_vm2, %v457_v59, %v1850_v28  ;;  %v1923_v62 = vpop.permute.xlu0 %550 }
  0xf6   : > { %v499_v63 = vmul.f32 %v483_v48, %v468_v61  ;;  %v500_v8 = vmul.f32 %v483_v48, %v464_v57 }
  0xf7   : > { %v1925_v9 = vadd.f32 %v440_v34, %v338_v54  ;;  %v1927_v0 = vadd.f32 %v441_v39, %v339_v58 }
  0xfa   : > { %776 = vperm.xlu1 %1378, %v765_v41   ;;  %829 = vrot.lane.b32.xlu2 %v1707_v4, %s1560_s29 }
  0xfb   : > { %939 = vrot.lane.b32.xlu0 %v1705_v3, %s1561_s30  ;;  %1381 = vset.pattern.permute.xlu2 %v1734_v13 }
  0xfc   : > { %v477_v28 = vpop.permute.xlu1 %476 }
  0xfd   : > { %v497_v16 = vmul.f32 %v477_v28, %v1866_v45  ;;  %v498_v17 = vmul.f32 %v477_v28, %v1862_v44  ;;  %v557_v18 = vpop.permute.xlu0 %556  ;;  %v1956_v44 = vld [vmem:[#allocation5 + $0xe] sm:$0x3]  ;;  %v555_v45 = vpop.permute.xlu2 %554 }
  0xfe   : > { %v1939_v19 = vsel %vm564_vm3, %v549_v14, %v557_v18  ;;  %v1943_v20 = vsel %vm564_vm3, %v557_v18, %v549_v14  ;;  %v969_v32 = vperm.slane %v1956_v44, 1  ;;  %v956_v53 = vperm.slane %v1956_v44, 0 }
  0xff   : > { %v1945_v21 = vadd.f32 %v499_v63, %v497_v16  ;;  %v1947_v23 = vadd.f32 %v500_v8, %v498_v17  ;;  %v1985_v16 = vld [vmem:[#allocation7 + $0x2] ss:$8 sm:$0x3] }
 0x102   : > { %833 = vrot.lane.b32.xlu1 %v1703_v2, %s1560_s29  ;;  %835 = vrot.lane.b32.xlu2 %v1712_v5, %s1560_s29 }
 0x103   : > { %1380 = vset.pattern.permute.xlu1 %v1698_v1  ;;  %945 = vrot.lane.b32.xlu0 %v1724_v10, %s1561_s30 }
 0x105   : > { %v563_v26 = vpop.permute.xlu0 %562  ;;  %v561_v54 = vpop.permute.xlu2 %560 }
 0x106   : > { %v1960_v27 = vsel %vm564_vm3, %v555_v45, %v563_v26  ;;  %v1964_v29 = vsel %vm564_vm3, %v563_v26, %v555_v45  ;;  %v536_v26 = vperm.slane %v1985_v16, 0 }
 0x10a   : > { %839 = vrot.lane.b32.xlu1 %v1714_v6, %s1560_s29  ;;  %841 = vrot.lane.b32.xlu2 %v1726_v11, %s1560_s29 }
 0x10b   : > { %980 = vperm.xlu0 %1382, %v969_v32  }
 0x10c   : > { %v496_v55 = vpop.permute.xlu1 %495 }
 0x10d   : > { %v503_v38 = vmul.f32 %v496_v55, %v1884_v56  ;;  %v504_v41 = vmul.f32 %v496_v55, %v1880_v60  ;;  %v592_v42 = vpop.permute.xlu0 %591  ;;  %v585_v45 = vpop.permute.xlu2 %584  ;;  %v537_v55 = vperm.slane %v1985_v16, 1 }
 0x10f   : > { %v519_v48 = vadd.f32 %v503_v38, %v501_v33  ;;  %v526_v52 = vadd.f32 %v504_v41, %v502_v35 }
 0x111   : > { %v520_v58 = vrot.slane %v519_v48, 4  ;;  %v527_v59 = vrot.slane %v526_v52, 4 }
 0x112   : > { %859 = vperm.xlu1 %1380, %v854_v43   ;;  %865 = vperm.xlu2 %1381, %v854_v43  }
 0x113   : > { %v521_v34 = vadd.f32 %v520_v58, %v519_v48  ;;  %v528_v39 = vadd.f32 %v527_v59, %v526_v52  ;;  %967 = vperm.xlu0 %1382, %v956_v53  }
 0x114   : > { %v553_v56 = vpop.permute.xlu1 %552 }
 0x115   : > { %v522_v57 = vrot.slane %v521_v34, 2  ;;  %v529_v60 = vrot.slane %v528_v39, 2  ;;  %v567_v61 = vsel %vm564_vm3, %v553_v56, %v561_v54  ;;  %v571_v33 = vsel %vm564_vm3, %v561_v54, %v553_v56  ;;  %v1983_v35 = vpop.permute.xlu0 %731 }
 0x116   : > { %v603_v63 = vmul.f32 %v592_v42, %v571_v33  ;;  %v604_v8 = vmul.f32 %v592_v42, %v567_v61 }
 0x117   : > { %v523_v14 = vadd.f32 %v522_v57, %v521_v34  ;;  %v530_v28 = vadd.f32 %v529_v60, %v528_v39 }
 0x119   : > { %v524_v17 = vrot.slane %v523_v14, 1  ;;  %v531_v18 = vrot.slane %v530_v28, 1 }
 0x11a   : > { %1383 = vset.pattern.permute.xlu1 %v1734_v13  ;;  %931 = vrot.lane.b32.xlu2 %v1707_v4, %s1561_s30 }
 0x11b   : > { %v525_v38 = vadd.f32 %v524_v17, %v523_v14  ;;  %v532_v41 = vadd.f32 %v531_v18, %v530_v28  ;;  %1385 = vset.pattern.permute.xlu2 %v1698_v1  ;;  %1033 = vrot.lane.b32.xlu0 %v1707_v4, %s1562_s4 }
 0x11c   : > { %v559_v42 = vpop.permute.xlu1 %558  ;;  %v2011_v57 = vpop.permute.xlu2 %655 }
 0x11d   : > { %v542_v43 = vmul.f32 %v536_v26, %v525_v38  ;;  %v543_v48 = vmul.f32 %v537_v55, %v532_v41  ;;  %v566_v52 = vsel %vm564_vm3, %v1923_v62, %v559_v42  ;;  %v570_v54 = vsel %vm564_vm3, %v559_v42, %v1923_v62  ;;  %v738_v58 = vpop.permute.xlu0 %737 }
 0x11e   : > { %v601_v59 = vmul.f32 %v585_v45, %v570_v54  ;;  %v602_v34 = vmul.f32 %v585_v45, %v566_v52  ;;  %v2052_v52 = vld [vmem:[#allocation7 + $0x3] ss:$8 sm:$0x3] }
 0x11f   : > { %v546_v39 = vadd.f32 %v542_v43, %v1925_v9  ;;  %v547_v56 = vadd.f32 %v543_v48, %v1927_v0  ;;  %v2313_v44 = vperm.slane %v2052_v52, 1  ;;  %v2321_v12 = vperm.slane %v2052_v52, 0 }
 0x122   : > { %878 = vperm.xlu1 %1383, %v867_v22   ;;  %937 = vrot.lane.b32.xlu2 %v1712_v5, %s1561_s30 }
 0x123   : > { %1043 = vrot.lane.b32.xlu0 %v1714_v6, %s1562_s4 }
 0x124   : > { %v579_v60 = vpop.permute.xlu1 %578 }
 0x125   : > { %v599_v62 = vmul.f32 %v579_v60, %v1943_v20  ;;  %v600_v61 = vmul.f32 %v579_v60, %v1939_v19  ;;  %v2017_v33 = vpop.permute.xlu0 %757 }
 0x127   : > { %v2019_v9 = vadd.f32 %v601_v59, %v599_v62  ;;  %v2021_v0 = vadd.f32 %v602_v34, %v600_v61  ;;  %v2314_v59 = vperm.slane %v2052_v52, 0  ;;  %v404_v61 = vrot.slane %v1868_v46, 4 }
 0x12a   : > { %935 = vrot.lane.b32.xlu1 %v1703_v2, %s1561_s30  ;;  %943 = vrot.lane.b32.xlu2 %v1726_v11, %s1561_s30 }
 0x12b   : > { %1384 = vset.pattern.permute.xlu1 %v1698_v1 }
 0x12c   : > { %v675_v15 = vpop.permute.xlu2 %674 }
 0x12d   : > { %v2028_v22 = vpop.permute.xlu0 %831  ;;  %v682_v34 = vmul.f32 %v675_v15, %v1712_v5  ;;  %v683_v60 = vmul.f32 %v675_v15, %v1724_v10 }
 0x132   : > { %941 = vrot.lane.b32.xlu1 %v1714_v6, %s1561_s30  ;;  %974 = vperm.xlu2 %1385, %v969_v32  }
 0x134   : > { %v598_v19 = vpop.permute.xlu1 %597  ;;  %v730_v20 = vpop.permute.xlu2 %729 }
 0x135   : > { %v605_v14 = vmul.f32 %v598_v19, %v1964_v29  ;;  %v606_v28 = vmul.f32 %v598_v19, %v1960_v27  ;;  %v2039_v1 = vsel %vm743_vm4, %v730_v20, %v738_v58  ;;  %v2043_v17 = vsel %vm743_vm4, %v738_v58, %v730_v20  ;;  %v2045_v41 = vpop.permute.xlu0 %837 }
 0x136   : > { %v411_v19 = vrot.slane %v1870_v47, 4 }
 0x137   : > { %v621_v18 = vadd.f32 %v605_v14, %v603_v63  ;;  %v628_v45 = vadd.f32 %v606_v28, %v604_v8 }
 0x139   : > { %v622_v38 = vrot.slane %v621_v18, 4  ;;  %v629_v32 = vrot.slane %v628_v45, 4 }
 0x13a   : > { %961 = vperm.xlu1 %1384, %v956_v53   ;;  %1039 = vrot.lane.b32.xlu2 %v1712_v5, %s1562_s4 }
 0x13b   : > { %v623_v27 = vadd.f32 %v622_v38, %v621_v18  ;;  %v630_v29 = vadd.f32 %v629_v32, %v628_v45  ;;  %1386 = vset.pattern.permute.xlu2 %v1734_v13  ;;  %v2072_v38 = vld [vmem:[#allocation5 + $0x10] sm:$0x3] }
 0x13c   : > { %v736_v42 = vpop.permute.xlu2 %735 }
 0x13d   : > { %v624_v43 = vrot.slane %v623_v27, 2  ;;  %v631_v48 = vrot.slane %v630_v29, 2  ;;  %v2062_v62 = vpop.permute.xlu0 %843 }
 0x13f   : > { %v625_v63 = vadd.f32 %v624_v43, %v623_v27  ;;  %v632_v8 = vadd.f32 %v631_v48, %v630_v29  ;;  %v405_v29 = vadd.f32 %v404_v61, %v1868_v46  ;;  %v412_v43 = vadd.f32 %v411_v19, %v1870_v47  ;;  %v2089_v19 = vld [vmem:[#allocation7 + $0x4] ss:$8 sm:$0x3] }
 0x140   : > { %v1071_v48 = vperm.slane %v2072_v38, 1  ;;  %v513_v61 = vrot.slane %v1947_v23, 4 }
 0x141   : > { %v626_v54 = vrot.slane %v625_v63, 1  ;;  %v633_v58 = vrot.slane %v632_v8, 1 }
 0x142   : > { %1037 = vrot.lane.b32.xlu1 %v1703_v2, %s1562_s4  ;;  %1047 = vrot.lane.b32.xlu2 %v1724_v10, %s1562_s4 }
 0x143   : > { %v627_v13 = vadd.f32 %v626_v54, %v625_v63  ;;  %v634_v53 = vadd.f32 %v633_v58, %v632_v8  ;;  %v406_v58 = vrot.slane %v405_v29, 2 }
 0x144   : > { %v669_v20 = vpop.permute.xlu1 %668  ;;  %v742_v14 = vpop.permute.xlu2 %741 }
 0x145   : > { %v644_v28 = vmul.f32 %v2314_v59, %v627_v13  ;;  %v645_v18 = vmul.f32 %v2313_v44, %v634_v53  ;;  %v680_v45 = vmul.f32 %v669_v20, %v1703_v2  ;;  %v681_v5 = vmul.f32 %v669_v20, %v1726_v11  ;;  %v2082_v47 = vpop.permute.xlu0 %872 }
 0x146   : > { %v413_v13 = vrot.slane %v412_v43, 2  ;;  %v514_v59 = vadd.f32 %v513_v61, %v1947_v23 }
 0x147   : > { %v648_v10 = vadd.f32 %v644_v28, %v546_v39  ;;  %v649_v15 = vadd.f32 %v645_v18, %v547_v56  ;;  %v698_v32 = vadd.f32 %v682_v34, %v680_v45  ;;  %v705_v27 = vadd.f32 %v683_v60, %v681_v5 }
 0x148   : > { %v506_v39 = vrot.slane %v1945_v21, 4  ;;  %v608_v18 = vrot.slane %v2019_v9, 4 }
 0x149   : > { %v699_v63 = vrot.slane %v698_v32, 4  ;;  %v706_v8 = vrot.slane %v705_v27, 4 }
 0x14a   : > { %1045 = vrot.lane.b32.xlu1 %v1726_v11, %s1562_s4  ;;  %1082 = vperm.xlu2 %1386, %v1071_v48  }
 0x14b   : > { %v700_v2 = vadd.f32 %v699_v63, %v698_v32  ;;  %v707_v54 = vadd.f32 %v706_v8, %v705_v27  ;;  %v407_v32 = vadd.f32 %v406_v58, %v405_v29  ;;  %v414_v27 = vadd.f32 %v413_v13, %v412_v43 }
 0x14c   : > { %v728_v56 = vpop.permute.xlu1 %727  ;;  %v2080_v53 = vpop.permute.xlu2 %770  ;;  %v507_v63 = vadd.f32 %v506_v39, %v1945_v21  ;;  %v715_v8 = vperm.slane %v2089_v19, 0 }
 0x14d   : > { %v701_v46 = vrot.slane %v700_v2, 2  ;;  %v708_v34 = vrot.slane %v707_v54, 2  ;;  %v744_v60 = vsel %vm743_vm4, %v728_v56, %v736_v42  ;;  %v748_v11 = vsel %vm743_vm4, %v736_v42, %v728_v56 }
 0x14e   : > { %v2092_v20 = vmul.f32 %v2017_v33, %v744_v60  ;;  %v2095_v28 = vmul.f32 %v2017_v33, %v748_v11  ;;  %v615_v42 = vrot.slane %v2021_v0, 4  ;;  %v2315_v56 = vperm.slane %v2089_v19, 1 }
 0x14f   : > { %v702_v45 = vadd.f32 %v701_v46, %v700_v2  ;;  %v709_v5 = vadd.f32 %v708_v34, %v707_v54  ;;  %v609_v33 = vadd.f32 %v608_v18, %v2019_v9  ;;  %v408_v21 = vrot.slane %v407_v32, 1 }
 0x150   : > { %v415_v2 = vrot.slane %v414_v27, 1  ;;  %v508_v54 = vrot.slane %v507_v63, 2  ;;  %v616_v58 = vadd.f32 %v615_v42, %v2021_v0  ;;  %v515_v18 = vrot.slane %v514_v59, 2 }
 0x151   : > { %v703_v44 = vrot.slane %v702_v45, 1  ;;  %v710_v60 = vrot.slane %v709_v5, 1 }
 0x152   : > { %1076 = vperm.xlu1 %1384, %v1071_v48   ;;  %1041 = vrot.lane.b32.xlu2 %v1705_v3, %s1562_s4  ;;  %v617_v42 = vrot.slane %v616_v58, 2 }
 0x153   : > { %v704_v29 = vadd.f32 %v703_v44, %v702_v45  ;;  %v711_v43 = vadd.f32 %v710_v60, %v709_v5  ;;  %v610_v45 = vrot.slane %v609_v33, 2  ;;  %v1058_v60 = vperm.slane %v2072_v38, 0 }
 0x154   : > { %v734_v13 = vpop.permute.xlu1 %733  ;;  %v830_v39 = vpop.permute.xlu2 %829 }
 0x155   : > { %v721_v23 = vmul.f32 %v715_v8, %v704_v29  ;;  %v722_v48 = vmul.f32 %v2315_v56, %v711_v43  ;;  %v2114_v9 = vsel %vm743_vm4, %v734_v13, %v742_v14  ;;  %v2118_v44 = vsel %vm743_vm4, %v742_v14, %v734_v13  ;;  %v280_v46 = vpop.permute.xlu0 %279 }
 0x156   : > { %v296_v34 = vmul.f32 %v280_v46, %v1799_v37  ;;  %v297_v0 = vmul.f32 %v280_v46, %v1795_v36  ;;  %v2125_v11 = vsel %vm845_vm5, %v830_v39, %v2045_v41  ;;  %v2130_v61 = vsel %vm845_vm5, %v2045_v41, %v830_v39 }
 0x157   : > { %v2132_v5 = vadd.f32 %v721_v23, %v648_v10  ;;  %v2134_v14 = vadd.f32 %v722_v48, %v649_v15  ;;  %v409_v41 = vadd.f32 %v408_v21, %v407_v32  ;;  %v416_v13 = vadd.f32 %v415_v2, %v414_v27 }
 0x158   : > { %v302_v37 = vadd.f32 %v296_v34, %v1781_v30  ;;  %v309_v36 = vadd.f32 %v297_v0, %v1783_v31  ;;  %v509_v39 = vadd.f32 %v508_v54, %v507_v63  ;;  %v516_v10 = vadd.f32 %v515_v18, %v514_v59 }
 0x159   : > { %v611_v23 = vadd.f32 %v610_v45, %v609_v33  ;;  %v618_v15 = vadd.f32 %v617_v42, %v616_v58 }
 0x15a   : > { %v303_v29 = vrot.slane %v302_v37, 4  ;;  %v310_v43 = vrot.slane %v309_v36, 4  ;;  %1035 = vrot.lane.b32.xlu1 %v1716_v7, %s1562_s4  ;;  %1069 = vperm.xlu2 %1386, %v1058_v60   ;;  %v517_v58 = vrot.slane %v516_v10, 1 }
 0x15c   : > { %v304_v48 = vadd.f32 %v303_v29, %v302_v37  ;;  %v311_v46 = vadd.f32 %v310_v43, %v309_v36  ;;  %v740_v56 = vpop.permute.xlu1 %739  ;;  %v836_v30 = vpop.permute.xlu2 %835  ;;  %v612_v37 = vrot.slane %v611_v23, 1  ;;  %v619_v36 = vrot.slane %v618_v15, 1 }
 0x15d   : > { %v746_v31 = vsel %vm743_vm4, %v1983_v35, %v740_v56  ;;  %v750_v38 = vsel %vm743_vm4, %v740_v56, %v1983_v35  ;;  %v662_v34 = vpop.permute.xlu0 %661  ;;  %v2150_v32 = vsel %vm845_vm5, %v836_v30, %v2062_v62  ;;  %v2155_v59 = vsel %vm845_vm5, %v2062_v62, %v836_v30 }
 0x15e   : > { %v305_v27 = vrot.slane %v304_v48, 2  ;;  %v312_v63 = vrot.slane %v311_v46, 2  ;;  %v2158_v33 = vmul.f32 %v2080_v53, %v746_v31  ;;  %v2161_v21 = vmul.f32 %v2080_v53, %v750_v38 }
 0x15f   : > { %v676_v35 = vmul.f32 %v2011_v57, %v1707_v4  ;;  %v677_v56 = vmul.f32 %v2011_v57, %v1705_v3  ;;  %v678_v2 = vmul.f32 %v662_v34, %v1716_v7  ;;  %v679_v54 = vmul.f32 %v662_v34, %v1714_v6 }
 0x160   : > { %v510_v62 = vrot.slane %v509_v39, 1  ;;  %v306_v0 = vadd.f32 %v305_v27, %v304_v48  ;;  %v313_v18 = vadd.f32 %v312_v63, %v311_v46  ;;  %v438_v4 = vmul.f32 %v434_v50, %v409_v41 }
 0x161   : > { %v684_v45 = vadd.f32 %v678_v2, %v676_v35  ;;  %v691_v42 = vadd.f32 %v679_v54, %v677_v56  ;;  %v439_v3 = vmul.f32 %v435_v51, %v416_v13  ;;  %v518_v43 = vadd.f32 %v517_v58, %v516_v10 }
 0x162   : > { %v307_v53 = vrot.slane %v306_v0, 1  ;;  %v314_v29 = vrot.slane %v313_v18, 1  ;;  %1063 = vperm.xlu1 %1384, %v1058_v60   ;;  %v511_v6 = vadd.f32 %v510_v62, %v509_v39  ;;  %v613_v60 = vadd.f32 %v612_v37, %v611_v23  ;;  %v815_v37 = vld [vmem:[#allocation7 + $0x5] ss:$8 sm:$0x3] }
 0x163   : > { %v685_v7 = vrot.slane %v684_v45, 4  ;;  %v692_v57 = vrot.slane %v691_v42, 4  ;;  %v620_v63 = vadd.f32 %v619_v36, %v618_v15  ;;  %v2322_v2 = vperm.slane %v2052_v52, 1 }
 0x164   : > { %v308_v30 = vadd.f32 %v307_v53, %v306_v0  ;;  %v315_v48 = vadd.f32 %v314_v29, %v313_v18  ;;  %v764_v46 = vpop.permute.xlu1 %763  ;;  %v540_v10 = vmul.f32 %v536_v26, %v511_v6 }
 0x165   : > { %v686_v31 = vadd.f32 %v685_v7, %v684_v45  ;;  %v693_v38 = vadd.f32 %v692_v57, %v691_v42  ;;  %v780_v34 = vmul.f32 %v764_v46, %v2039_v1  ;;  %v781_v27 = vmul.f32 %v764_v46, %v2043_v17 }
 0x166   : > { %v336_v50 = vmul.f32 %v332_v25, %v308_v30  ;;  %v337_v40 = vmul.f32 %v333_v49, %v315_v48  ;;  %v541_v1 = vmul.f32 %v537_v55, %v518_v43  ;;  %v642_v49 = vmul.f32 %v2321_v12, %v613_v60  ;;  %v842_v43 = vpop.permute.xlu2 %841 }
 0x167   : > { %v687_v51 = vrot.slane %v686_v31, 2  ;;  %v694_v41 = vrot.slane %v693_v38, 2  ;;  %v786_v13 = vadd.f32 %v780_v34, %v2092_v20  ;;  %v793_v39 = vadd.f32 %v781_v27, %v2095_v28 }
 0x168   : > { %v442_v17 = vadd.f32 %v438_v4, %v336_v50  ;;  %v443_v23 = vadd.f32 %v439_v3, %v337_v40  ;;  %v643_v20 = vmul.f32 %v2322_v2, %v620_v63  ;;  %v2323_v3 = vperm.slane %v2089_v19, 1 }
 0x169   : > { %v688_v15 = vadd.f32 %v687_v51, %v686_v31  ;;  %v695_v35 = vadd.f32 %v694_v41, %v693_v38  ;;  %v787_v25 = vrot.slane %v786_v13, 4  ;;  %v794_v56 = vrot.slane %v793_v39, 4 }
 0x16a   : > { %v544_v54 = vadd.f32 %v540_v10, %v442_v17  ;;  %v545_v28 = vadd.f32 %v541_v1, %v443_v23  ;;  %v817_v30 = vperm.slane %v815_v37, 0  ;;  %v818_v48 = vperm.slane %v815_v37, 1 }
 0x16b   : > { %v689_v62 = vrot.slane %v688_v15, 1  ;;  %v696_v58 = vrot.slane %v695_v35, 1  ;;  %v788_v26 = vadd.f32 %v787_v25, %v786_v13  ;;  %v795_v0 = vadd.f32 %v794_v56, %v793_v39 }
 0x16c   : > { %v646_v16 = vadd.f32 %v642_v49, %v544_v54  ;;  %v647_v55 = vadd.f32 %v643_v20, %v545_v28  ;;  %v777_v18 = vpop.permute.xlu1 %776 }
 0x16d   : > { %v690_v45 = vadd.f32 %v689_v62, %v688_v15  ;;  %v697_v42 = vadd.f32 %v696_v58, %v695_v35  ;;  %v789_v36 = vrot.slane %v788_v26, 2  ;;  %v796_v53 = vrot.slane %v795_v0, 2 }
 0x16e   : > { %v784_v29 = vmul.f32 %v777_v18, %v2114_v9  ;;  %v785_v4 = vmul.f32 %v777_v18, %v2118_v44  ;;  %v866_v25 = vpop.permute.xlu2 %865 }
 0x16f   : > { %v719_v52 = vmul.f32 %v715_v8, %v690_v45  ;;  %v720_v7 = vmul.f32 %v2323_v3, %v697_v42  ;;  %v790_v57 = vadd.f32 %v789_v36, %v788_v26  ;;  %v797_v6 = vadd.f32 %v796_v53, %v795_v0 }
 0x170   : > { %v800_v46 = vadd.f32 %v784_v29, %v2158_v33  ;;  %v807_v31 = vadd.f32 %v785_v4, %v2161_v21 }
 0x171   : > { %v723_v38 = vadd.f32 %v719_v52, %v646_v16  ;;  %v724_v34 = vadd.f32 %v720_v7, %v647_v55  ;;  %v791_v9 = vrot.slane %v790_v57, 1  ;;  %v798_v27 = vrot.slane %v797_v6, 1 }
 0x172   : > { %v801_v44 = vrot.slane %v800_v46, 4  ;;  %v808_v60 = vrot.slane %v807_v31, 4 }
 0x173   : > { %v792_v63 = vadd.f32 %v791_v9, %v790_v57  ;;  %v799_v8 = vadd.f32 %v798_v27, %v797_v6  ;;  %v917_v57 = vld [vmem:[#allocation7 + $0x6] ss:$8 sm:$0x3] }
 0x174   : > { %v802_v50 = vadd.f32 %v801_v44, %v800_v46  ;;  %v809_v19 = vadd.f32 %v808_v60, %v807_v31  ;;  %v834_v40 = vpop.permute.xlu1 %833  ;;  %v934_v46 = vpop.permute.xlu0 %933 }
 0x175   : > { %v821_v51 = vmul.f32 %v817_v30, %v792_v63  ;;  %v822_v41 = vmul.f32 %v818_v48, %v799_v8  ;;  %v848_v13 = vsel %vm845_vm5, %v834_v40, %v842_v43  ;;  %v852_v33 = vsel %vm845_vm5, %v842_v43, %v834_v40 }
 0x176   : > { %v803_v21 = vrot.slane %v802_v50, 2  ;;  %v810_v39 = vrot.slane %v809_v19, 2  ;;  %v884_v10 = vmul.f32 %v2082_v47, %v848_v13  ;;  %v885_v1 = vmul.f32 %v2082_v47, %v852_v33  ;;  %v2211_v55 = vpop.permute.xlu2 %931 }
 0x177   : > { %v825_v17 = vadd.f32 %v821_v51, %v723_v38  ;;  %v826_v23 = vadd.f32 %v822_v41, %v724_v34  ;;  %v920_v43 = vperm.slane %v917_v57, 1 }
 0x178   : > { %v804_v15 = vadd.f32 %v803_v21, %v802_v50  ;;  %v811_v35 = vadd.f32 %v810_v39, %v809_v19 }
 0x17a   : > { %v805_v56 = vrot.slane %v804_v15, 1  ;;  %v812_v12 = vrot.slane %v811_v35, 1 }
 0x17c   : > { %v806_v49 = vadd.f32 %v805_v56, %v804_v15  ;;  %v813_v2 = vadd.f32 %v812_v12, %v811_v35  ;;  %v840_v20 = vpop.permute.xlu1 %839  ;;  %v940_v33 = vpop.permute.xlu0 %939 }
 0x17d   : > { %v847_v54 = vsel %vm845_vm5, %v2028_v22, %v840_v20  ;;  %v851_v28 = vsel %vm845_vm5, %v840_v20, %v2028_v22 }
 0x17e   : > { %v823_v62 = vmul.f32 %v817_v30, %v806_v49  ;;  %v824_v47 = vmul.f32 %v818_v48, %v813_v2  ;;  %v882_v58 = vmul.f32 %v866_v25, %v847_v54  ;;  %v883_v26 = vmul.f32 %v866_v25, %v851_v28  ;;  %v938_v7 = vpop.permute.xlu2 %937 }
 0x180   : > { %v827_v0 = vadd.f32 %v823_v62, %v2132_v5  ;;  %v828_v16 = vadd.f32 %v824_v47, %v2134_v14  ;;  %v919_v14 = vperm.slane %v917_v57, 0 }
 0x184   : > { %v860_v18 = vpop.permute.xlu1 %859 }
 0x185   : > { %v880_v45 = vmul.f32 %v860_v18, %v2125_v11  ;;  %v881_v42 = vmul.f32 %v860_v18, %v2130_v61 }
 0x186   : > { %v944_v63 = vpop.permute.xlu2 %943 }
 0x187   : > { %v888_v37 = vadd.f32 %v882_v58, %v880_v45  ;;  %v895_v36 = vadd.f32 %v883_v26, %v881_v42 }
 0x189   : > { %v889_v53 = vrot.slane %v888_v37, 4  ;;  %v896_v29 = vrot.slane %v895_v36, 4 }
 0x18b   : > { %v890_v22 = vadd.f32 %v889_v53, %v888_v37  ;;  %v897_v4 = vadd.f32 %v896_v29, %v895_v36 }
 0x18d   : > { %v891_v52 = vrot.slane %v890_v22, 2  ;;  %v898_v3 = vrot.slane %v897_v4, 2 }
 0x18f   : > { %v892_v5 = vadd.f32 %v891_v52, %v890_v22  ;;  %v899_v6 = vadd.f32 %v898_v3, %v897_v4 }
 0x191   : > { %v893_v30 = vrot.slane %v892_v5, 1  ;;  %v900_v48 = vrot.slane %v899_v6, 1 }
 0x193   : > { %v894_v11 = vadd.f32 %v893_v30, %v892_v5  ;;  %v901_v31 = vadd.f32 %v900_v48, %v899_v6  ;;  %v952_v5 = vsel %vm947_vm6, %v940_v33, %v2211_v55  ;;  %v948_v48 = vsel %vm947_vm6, %v2211_v55, %v940_v33 }
 0x194   : > { %v879_v61 = vpop.permute.xlu1 %878 }
 0x195   : > { %v923_v38 = vmul.f32 %v919_v14, %v894_v11  ;;  %v924_v34 = vmul.f32 %v920_v43, %v901_v31  ;;  %v886_v9 = vmul.f32 %v879_v61, %v2150_v32  ;;  %v887_v27 = vmul.f32 %v879_v61, %v2155_v59  ;;  %v975_v59 = vpop.permute.xlu2 %974 }
 0x197   : > { %v2217_v44 = vadd.f32 %v923_v38, %v825_v17  ;;  %v2219_v60 = vadd.f32 %v924_v34, %v826_v23  ;;  %v902_v8 = vadd.f32 %v886_v9, %v884_v10  ;;  %v909_v50 = vadd.f32 %v887_v27, %v885_v1  ;;  %v946_v10 = vpop.permute.xlu0 %945 }
 0x198   : > { %v955_v62 = vsel %vm947_vm6, %v946_v10, %v938_v7 }
 0x199   : > { %v903_v19 = vrot.slane %v902_v8, 4  ;;  %v910_v40 = vrot.slane %v909_v50, 4 }
 0x19b   : > { %v904_v51 = vadd.f32 %v903_v19, %v902_v8  ;;  %v911_v41 = vadd.f32 %v910_v40, %v909_v50 }
 0x19c   : > { %v936_v13 = vpop.permute.xlu1 %935 }
 0x19d   : > { %v905_v21 = vrot.slane %v904_v51, 2  ;;  %v912_v39 = vrot.slane %v911_v41, 2  ;;  %v1040_v20 = vpop.permute.xlu2 %1039  ;;  %v954_v28 = vsel %vm947_vm6, %v944_v63, %v936_v13  ;;  %v950_v47 = vsel %vm947_vm6, %v936_v13, %v944_v63 }
 0x19e   : > { %v987_v58 = vmul.f32 %v975_v59, %v954_v28  ;;  %v986_v18 = vmul.f32 %v975_v59, %v950_v47 }
 0x19f   : > { %v906_v15 = vadd.f32 %v905_v21, %v904_v51  ;;  %v913_v35 = vadd.f32 %v912_v39, %v911_v41  ;;  %v981_v26 = vpop.permute.xlu0 %980 }
 0x1a1   : > { %v907_v32 = vrot.slane %v906_v15, 1  ;;  %v914_v25 = vrot.slane %v913_v35, 1 }
 0x1a3   : > { %v908_v17 = vadd.f32 %v907_v32, %v906_v15  ;;  %v915_v56 = vadd.f32 %v914_v25, %v913_v35  ;;  %v2253_v32 = vld [vmem:[#allocation7 + $0x7] ss:$8 sm:$0x3] }
 0x1a4   : > { %v942_v23 = vpop.permute.xlu1 %941 }
 0x1a5   : > { %v925_v12 = vmul.f32 %v919_v14, %v908_v17  ;;  %v926_v49 = vmul.f32 %v920_v43, %v915_v56  ;;  %v1048_v36 = vpop.permute.xlu2 %1047  ;;  %v949_v43 = vsel %vm947_vm6, %v934_v46, %v942_v23 }
 0x1a6   : > { %v1053_v61 = vsel %vm1049_vm7, %v1040_v20, %v1048_v36  ;;  %v1057_v38 = vsel %vm1049_vm7, %v1048_v36, %v1040_v20 }
 0x1a7   : > { %v2221_v1 = vadd.f32 %v925_v12, %v827_v0  ;;  %v2223_v2 = vadd.f32 %v926_v49, %v828_v16  ;;  %v951_v0 = vsel %vm947_vm6, %v938_v7, %v946_v10  ;;  %v989_v16 = vmul.f32 %v981_v26, %v955_v62  ;;  %v968_v4 = vpop.permute.xlu0 %967  ;;  %v2256_v62 = vld [vmem:[#allocation7 + $0x10] ss:$8 sm:$0x3] }
 0x1a8   : > { %v988_v45 = vmul.f32 %v981_v26, %v951_v0  ;;  %v953_v7 = vsel %vm947_vm6, %v942_v23, %v934_v46  ;;  %v984_v34 = vmul.f32 %v968_v4, %v949_v43  ;;  %v1022_v10 = vperm.slane %v2253_v32, 1 }
 0x1a9   : > { %v1011_v42 = vadd.f32 %v989_v16, %v987_v58  ;;  %v985_v31 = vmul.f32 %v968_v4, %v953_v7  ;;  %v1021_v26 = vperm.slane %v2253_v32, 0 }
 0x1aa   : > { %v1004_v53 = vadd.f32 %v988_v45, %v986_v18 }
 0x1ab   : > { %v1012_v29 = vrot.slane %v1011_v42, 4 }
 0x1ac   : > { %v962_v54 = vpop.permute.xlu1 %961  ;;  %v1005_v22 = vrot.slane %v1004_v53, 4 }
 0x1ad   : > { %v1013_v52 = vadd.f32 %v1012_v29, %v1011_v42  ;;  %v1083_v6 = vpop.permute.xlu2 %1082  ;;  %v983_v30 = vmul.f32 %v962_v54, %v952_v5  ;;  %v982_v9 = vmul.f32 %v962_v54, %v948_v48  ;;  %v1124_v29 = vperm.slane %v2256_v62, 1 }
 0x1ae   : > { %v1006_v57 = vadd.f32 %v1005_v22, %v1004_v53  ;;  %v1090_v19 = vmul.f32 %v1083_v6, %v1053_v61  ;;  %v1091_v40 = vmul.f32 %v1083_v6, %v1057_v38  ;;  %v1123_v53 = vperm.slane %v2256_v62, 0 }
 0x1af   : > { %v1014_v14 = vrot.slane %v1013_v52, 2  ;;  %v997_v63 = vadd.f32 %v985_v31, %v983_v30  ;;  %v1034_v55 = vpop.permute.xlu0 %1033  ;;  %v990_v33 = vadd.f32 %v984_v34, %v982_v9 }
 0x1b0   : > { %v1007_v11 = vrot.slane %v1006_v57, 2 }
 0x1b1   : > { %v1015_v27 = vadd.f32 %v1014_v14, %v1013_v52  ;;  %v998_v35 = vrot.slane %v997_v63, 4  ;;  %v991_v23 = vrot.slane %v990_v33, 4 }
 0x1b2   : > { %v1008_v13 = vadd.f32 %v1007_v11, %v1006_v57 }
 0x1b3   : > { %v1016_v15 = vrot.slane %v1015_v27, 1  ;;  %v999_v54 = vadd.f32 %v998_v35, %v997_v63  ;;  %v992_v18 = vadd.f32 %v991_v23, %v990_v33 }
 0x1b4   : > { %v1038_v37 = vpop.permute.xlu1 %1037  ;;  %v1009_v56 = vrot.slane %v1008_v13, 1 }
 0x1b5   : > { %v1042_v25 = vpop.permute.xlu2 %1041  ;;  %v1017_v20 = vadd.f32 %v1016_v15, %v1015_v27  ;;  %v1000_v36 = vrot.slane %v999_v54, 2  ;;  %v993_v7 = vrot.slane %v992_v18, 2 }
 0x1b6   : > { %v1010_v0 = vadd.f32 %v1009_v56, %v1008_v13  ;;  %v1050_v5 = vsel %vm1049_vm7, %v1034_v55, %v1042_v25  ;;  %v1054_v30 = vsel %vm1049_vm7, %v1042_v25, %v1034_v55 }
 0x1b7   : > { %v1044_v16 = vpop.permute.xlu0 %1043  ;;  %v1001_v11 = vadd.f32 %v1000_v36, %v999_v54 }
 0x1b8   : > { %v1027_v57 = vmul.f32 %v1021_v26, %v1010_v0 }
 0x1bc   : > { %v1046_v3 = vpop.permute.xlu1 %1045 }
 0x1bd   : > { %v1052_v46 = vsel %vm1049_vm7, %v1038_v37, %v1046_v3  ;;  %v1056_v8 = vsel %vm1049_vm7, %v1046_v3, %v1038_v37  ;;  %v1028_v37 = vmul.f32 %v1022_v10, %v1017_v20  ;;  %v1070_v6 = vpop.permute.xlu2 %1069 }
 0x1bf   : > { %v1032_v48 = vadd.f32 %v1028_v37, %v2223_v2 }
 0x1c4   : > { %v1077_v50 = vpop.permute.xlu1 %1076 }
 0x1c5   : > { %v1088_v51 = vmul.f32 %v1077_v50, %v1052_v46  ;;  %v1089_v41 = vmul.f32 %v1077_v50, %v1056_v8  ;;  %v1031_v46 = vadd.f32 %v1027_v57, %v2221_v1  ;;  %v994_v8 = vadd.f32 %v993_v7, %v992_v18 }
 0x1c7   : > { %v1106_v21 = vadd.f32 %v1090_v19, %v1088_v51  ;;  %v1113_v39 = vadd.f32 %v1091_v40, %v1089_v41  ;;  %v1002_v51 = vrot.slane %v1001_v11, 1  ;;  %v995_v13 = vrot.slane %v994_v8, 1 }
 0x1c9   : > { %v1107_v59 = vrot.slane %v1106_v21, 4  ;;  %v1114_v17 = vrot.slane %v1113_v39, 4  ;;  %v1003_v15 = vadd.f32 %v1002_v51, %v1001_v11  ;;  %v996_v32 = vadd.f32 %v995_v13, %v994_v8 }
 0x1cb   : > { %v1108_v12 = vadd.f32 %v1107_v59, %v1106_v21  ;;  %v1115_v49 = vadd.f32 %v1114_v17, %v1113_v39  ;;  %v1026_v17 = vmul.f32 %v1022_v10, %v1003_v15 }
 0x1cc   : > { %v1036_v28 = vpop.permute.xlu1 %1035 }
 0x1cd   : > { %v1109_v47 = vrot.slane %v1108_v12, 2  ;;  %v1116_v58 = vrot.slane %v1115_v49, 2  ;;  %v1051_v52 = vsel %vm1049_vm7, %v1036_v28, %v1044_v16  ;;  %v1055_v3 = vsel %vm1049_vm7, %v1044_v16, %v1036_v28 }
 0x1ce   : > { %v1086_v31 = vmul.f32 %v1070_v6, %v1051_v52  ;;  %v1087_v61 = vmul.f32 %v1070_v6, %v1055_v3  ;;  %v1030_v54 = vadd.f32 %v1026_v17, %v2219_v60 }
 0x1cf   : > { %v1110_v45 = vadd.f32 %v1109_v47, %v1108_v12  ;;  %v1117_v42 = vadd.f32 %v1116_v58, %v1115_v49  ;;  %v1025_v12 = vmul.f32 %v1021_v26, %v996_v32 }
 0x1d1   : > { %v1111_v22 = vrot.slane %v1110_v45, 1  ;;  %v1118_v4 = vrot.slane %v1117_v42, 1  ;;  %v1029_v47 = vadd.f32 %v1025_v12, %v2217_v44 }
 0x1d3   : > { %v1112_v14 = vadd.f32 %v1111_v22, %v1110_v45  ;;  %v1119_v43 = vadd.f32 %v1118_v4, %v1117_v42 }
 0x1d4   : > { %v1064_v38 = vpop.permute.xlu1 %1063 }
 0x1d5   : > { %v1129_v34 = vmul.f32 %v1123_v53, %v1112_v14  ;;  %v1130_v9 = vmul.f32 %v1124_v29, %v1119_v43  ;;  %v1084_v27 = vmul.f32 %v1064_v38, %v1050_v5  ;;  %v1085_v63 = vmul.f32 %v1064_v38, %v1054_v30 }
 0x1d7   : > { %v1134_v50 = vadd.f32 %v1130_v9, %v1032_v48  ;;  %v1092_v19 = vadd.f32 %v1086_v31, %v1084_v27  ;;  %v1099_v40 = vadd.f32 %v1087_v61, %v1085_v63  ;;  %v1133_v24 = vadd.f32 %v1129_v34, %v1031_v46 }
 0x1d9   : > { %v1140_v55 = vrot.slane %v1134_v50, 6  ;;  %v1093_v41 = vrot.slane %v1092_v19, 4  ;;  %v1100_v2 = vrot.slane %v1099_v40, 4 }
 0x1db   : > { %v1094_v33 = vadd.f32 %v1093_v41, %v1092_v19  ;;  %v1101_v21 = vadd.f32 %v1100_v2, %v1099_v40  ;;  %v1143_v39 = vsel %vm1141_vm8, %v1133_v24, %v1140_v55 }
 0x1dc   : > { %v1148_v26 = vrot.slane %v1143_v39, 7 }
 0x1dd   : > { %v1095_v35 = vrot.slane %v1094_v33, 2  ;;  %v1102_v1 = vrot.slane %v1101_v21, 2 }
 0x1df   : > { %v1096_v25 = vadd.f32 %v1095_v35, %v1094_v33  ;;  %v1103_v59 = vadd.f32 %v1102_v1, %v1101_v21 }
 0x1e1   : > { %v1097_v56 = vrot.slane %v1096_v25, 1  ;;  %v1104_v23 = vrot.slane %v1103_v59, 1 }
 0x1e3   : > { %v1098_v49 = vadd.f32 %v1097_v56, %v1096_v25  ;;  %v1105_v20 = vadd.f32 %v1104_v23, %v1103_v59 }
 0x1e5   : > { %v1127_v28 = vmul.f32 %v1123_v53, %v1098_v49  ;;  %v1128_v62 = vmul.f32 %v1124_v29, %v1105_v20 }
 0x1e7   : > { %v1132_v58 = vadd.f32 %v1128_v62, %v1030_v54  ;;  %v1131_v0 = vadd.f32 %v1127_v28, %v1029_v47 }
 0x1e9   : > { %v1139_v10 = vrot.slane %v1132_v58, 6 }
 0x1eb   : > { %v1142_v16 = vsel %vm1141_vm8, %v1131_v0, %v1139_v10 }
 0x1ec   : > { %v1150_v60 = vsel %vm1149_vm9, %v1148_v26, %v1142_v16 }
 0x1ed   : > { %v1152_v44 = vsel %vm1151_vm10, %v1148_v26, %v1150_v60 }
 0x1ee   : > { %v1154_v18 = vsel %vm1153_vm11, %v1148_v26, %v1152_v44 }
 0x1ef   : > { %v1156_v45 = vsel %vm1155_vm12, %v1148_v26, %v1154_v18 }
 0x1f0   : > { %1158 = vst [vmem:[%s223_s25] sm:$0xf] %v1156_v45 }
 0x1f1   : > { %1504 = shalt.err (!%p1501_p10)
}
 0x1f2   : > { %1295 = dma.vmem_to_hbm [thread:$0]  (%p1655_p5), %s1174_s26, 64, %s1176_s16, %s1160_s27  }
 0x1f3 PF: > { %s1187_s20 = sand.u32 1, %s1535_s12   ;;  %p2324_p12 = scmp.ge.s32.totalorder %s1547_s15, 2 }
 0x1f4   : > { %s1188_s30 = scalar_lea.sflag [#allocation4], %s1187_s20 }
 0x1f5   : > { %p1309_p13 = pnand %p2324_p12, %p1618_p6 }
 0x1f7   : > { %p1310_p0 = pneg %p1309_p13 }
 0x1f9   : > { %1530 = dma.done.wait (%p1310_p0), %s1188_s30, 64  }
 0x1fa   : > { %1532 = vsyncadd (%p1310_p0), %s1188_s30, 4294967232  ;;  %p17_p3 = scmp.ge.s32.totalorder %s1642_s8, 4   ;;  %s2325_s12 = smov %s1539_s13 }
 0x1fb   : > { %s2326_s13 = smov %s1543_s14  ;;  %s2327_s14 = smov %s1651_s11 }
 0x1fc   : > { %s2328_s15 = smov %s1642_s8  ;;  %19 = sbr.rel (!%p17_p3) target bundleno = 6 (0x6), region = 93 }
 0x201   :  { %1194 = vsyncpa [#allocation3], 1 }
 0x202   :  { %1196 = vsyncpa [#allocation3 + $0x1], 1 }
 0x203   :  { %1197 = vsyncpa [#allocation6], 1 }
 0x204   :  { %1198 = vsyncpa [#allocation4], 1 }
 0x205   :  { %1200 = vsyncpa [#allocation4 + $0x1], 1 }

</bundles_post_ra>
